<compile_context>
chip_gen: v7x
topology: tpu7x:2x2x1
jax: 0.10.0
libtpu: 0.0.40
codegen_flags: <defaults>
</compile_context>

<pallas_src>
import functools

import jax
import jax.numpy as jnp
from jax import lax
from jax.experimental import pallas as pl
from jax.experimental.pallas import tpu as pltpu

# ---- synthetic, small hyper-parameters (the module's globals) ----
B, S = 2, 8                     # batch, sequence length
WORD_VOCAB = 50                 # len(word_vocab)
DIST_VOCAB = 20                 # dist_vocab_size
WORD_DIM = 16                   # word_embed_dim
DIST_DIM = 8                    # distance_embed_dim
DIN = WORD_DIM + 2 * DIST_DIM   # input_dim = 32
H1 = DIN                        # GRU hidden per direction = hidden_dim / 2
H2 = 2 * H1                     # hidden_dim = 64
G = 3 * H1                      # packed r|z|n gate width = 96
NUM_FILTER = 32                 # conv_filter_cnt
NUM_CLASS = 5                   # len(relation_cls_label_map)
NEG_BIG = -1e30                 # finite python float: no const capture, no NaN

# ---- packed-operand row offsets ----
# gw slab: (2*H1 + 3, 256)
GW_WHH = 0                      # rows [0, H1):      whh, fwd@lanes[0:96) bwd@[128:224)
GW_WIH = H1                     # rows [H1, 2*H1):   wih, same lane layout
GW_BX = 2 * H1                  # row: input-side gate biases, same lane layout
GW_BHN_F = 2 * H1 + 1           # row: b_hn (fwd) in lanes [0:H1)
GW_BHN_B = 2 * H1 + 2           # row: b_hn (bwd) in lanes [0:H1)
GW_ROWS = 2 * H1 + 3
# ew slab: (355, 64)
EW_WA = 0                       # rows [0, 64):      attention A (H2 x H2)
EW_CW = H2                      # rows [64, 256):    3 conv taps, each (H2 x F)
EW_DW = EW_CW + 3 * H2          # rows [256, 352):   dense weight (3F x C), lane-padded
EW_WR = EW_DW + 3 * NUM_FILTER  # row 352:           wr^T (1 x H2)
EW_CB = EW_WR + 1               # row 353:           conv bias, lane-padded
EW_DB = EW_CB + 1               # row 354:           dense bias, lane-padded
EW_ROWS = EW_DB + 1             # 355


def _sigmoid(x):
    # sigmoid via tanh: single EUP transcendental, no divide.
    return 0.5 * (jnp.tanh(0.5 * x) + 1.0)


def _mxu(a, b):
    # explicit bf16 operands -> guaranteed single-pass MXU; f32 accumulate.
    return jnp.dot(a.astype(jnp.bfloat16), b.astype(jnp.bfloat16),
                   preferred_element_type=jnp.float32)


# ----------------------------------------------------------------------------
# Pallas kernel: whole post-embedding forward pass (time-major activations,
# row index = t*B + b).
# ----------------------------------------------------------------------------
def bgwa_kernel(x_ref, masks_ref, gw_ref, ew_ref, out_ref, fwd_sc, bwd_sc):
    # ---------------- bidirectional GRU (PyTorch gate order r, z, n) --------
    whh = gw_ref[GW_WHH:GW_WHH + H1, :].astype(jnp.bfloat16)       # (H1, 256)
    wih = gw_ref[GW_WIH:GW_WIH + H1, :]                            # (H1, 256)
    bx = gw_ref[GW_BX:GW_BX + 1, :]                                # (1, 256)
    bhn = jnp.concatenate(
        [jnp.broadcast_to(gw_ref[GW_BHN_F:GW_BHN_F + 1, 0:H1], (B, H1)),
         jnp.broadcast_to(gw_ref[GW_BHN_B:GW_BHN_B + 1, 0:H1], (B, H1))],
        axis=0)                                                    # (2B, H1)

    # Input projections for every timestep / gate / direction in one matmul.
    xproj = _mxu(x_ref[...], wih) + bx                             # (S*B, 256)

    # Per-step (2B, G) gate inputs, fully hoisted off the recurrence chain:
    #   rows [0:B)  -> forward direction, timestep t
    #   rows [B:2B) -> backward direction, timestep S-1-t
    xp_steps = [
        jnp.concatenate(
            [xproj[t * B:(t + 1) * B, 0:G],
             xproj[(S - 1 - t) * B:(S - t) * B, 128:128 + G]], axis=0)
        for t in range(S)]

    is_fwd = lax.broadcasted_iota(jnp.int32, (2 * B, G), 0) < B    # hoisted

    h = jnp.zeros((2 * B, H1), jnp.float32)        # rows: [fwd(B) ; bwd(B)]
    for t in range(S):                             # fully unrolled, 8 steps
        hh_full = jnp.dot(h.astype(jnp.bfloat16), whh,
                          preferred_element_type=jnp.float32)      # (2B, 256)
        # lane-aligned per-row gate pick: fwd lanes [0:96), bwd lanes [128:224)
        hh = jnp.where(is_fwd, hh_full[:, 0:G], hh_full[:, 128:128 + G])
        xp_t = xp_steps[t]
        rz = _sigmoid(xp_t[:, 0:2 * H1] + hh[:, 0:2 * H1])         # fused r|z
        r = rz[:, 0:H1]
        z = rz[:, H1:2 * H1]
        n = jnp.tanh(xp_t[:, 2 * H1:G] + r * (hh[:, 2 * H1:G] + bhn))
        h = (1.0 - z) * n + z * h                                  # (2B, H1)
        fwd_sc[t * B:(t + 1) * B, :] = h[0:B, :]                   # fwd out @ t
        bwd_sc[(S - 1 - t) * B:(S - t) * B, :] = h[B:2 * B, :]     # bwd out @ S-1-t

    # One lane concat -> (S*B, H2) gru_out, time-major rows.
    g2 = jnp.concatenate([fwd_sc[...], bwd_sc[...]], axis=1)

    # ---------------- word-level attention ----------------------------------
    wmask = masks_ref[:, 0:1]                                      # (S*B, 1)
    a = jnp.tanh(_mxu(g2, ew_ref[EW_WA:EW_WA + H2, :]))            # (S*B, H2)
    wr_row = ew_ref[EW_WR:EW_WR + 1, :]                            # (1, H2)
    scores = jnp.sum(a * wr_row, axis=1, keepdims=True)            # (S*B, 1)
    scores = jnp.where(wmask > 0, scores, NEG_BIG)

    # softmax over time (rows t*B + b), unrolled over the 8 time steps (2-D only)
    m = scores[0:B, :]
    for t in range(1, S):
        m = jnp.maximum(m, scores[t * B:(t + 1) * B, :])
    e = jnp.exp(scores - jnp.tile(m, (S, 1)))
    den = e[0:B, :]
    for t in range(1, S):
        den = den + e[t * B:(t + 1) * B, :]
    attn = e / jnp.tile(den, (S, 1))                               # (S*B, 1)

    inp = g2 * (attn * wmask)                                      # (S*B, H2)

    # ---------------- PCNN: Conv1d(k=3, pad=1), channels-last ---------------
    zrow = jnp.zeros((B, H2), jnp.float32)
    x_m1 = jnp.concatenate([zrow, inp[:S * B - B, :]], axis=0)     # time t-1
    x_p1 = jnp.concatenate([inp[B:, :], zrow], axis=0)             # time t+1
    conv = (_mxu(x_m1, ew_ref[EW_CW:EW_CW + H2, 0:NUM_FILTER])
            + _mxu(inp, ew_ref[EW_CW + H2:EW_CW + 2 * H2, 0:NUM_FILTER])
            + _mxu(x_p1, ew_ref[EW_CW + 2 * H2:EW_CW + 3 * H2, 0:NUM_FILTER])
            + ew_ref[EW_CB:EW_CB + 1, 0:NUM_FILTER])               # (S*B, F)

    def piece(col):
        pm = masks_ref[:, col:col + 1]                             # (S*B, 1)
        masked = jnp.where(pm > 0, conv, NEG_BIG)                  # (S*B, F)
        acc = masked[0:B, :]
        for t in range(1, S):                                      # max over time
            acc = jnp.maximum(acc, masked[t * B:(t + 1) * B, :])
        return jnp.tanh(acc)                                       # (B, F)

    feats = jnp.concatenate([piece(1), piece(2), piece(3)], axis=1)  # (B, 3F)
    out = (_mxu(feats, ew_ref[EW_DW:EW_DW + 3 * NUM_FILTER, 0:NUM_CLASS])
           + ew_ref[EW_DB:EW_DB + 1, 0:NUM_CLASS])                 # (B, classes)
    out_ref[...] = out


# ----------------------------------------------------------------------------
# Host-side one-time weight packing (outside the per-call jit).
# ----------------------------------------------------------------------------
def pack_params(P):
    def cat_gates(w):                 # (3, X, H1) -> (X, 3*H1), order r|z|n
        return jnp.concatenate([w[0], w[1], w[2]], axis=1)

    def bias_block(bih, bhh):         # fold b_ih+b_hh for r,z; b_in alone for n
        return jnp.concatenate([bih[0] + bhh[0], bih[1] + bhh[1], bih[2]], axis=1)

    def pack256(fwd, bwd):            # (R, G) x2 -> (R, 256), lane-aligned halves
        pad = jnp.zeros((fwd.shape[0], 128 - G), jnp.float32)
        return jnp.concatenate([fwd, pad, bwd, pad], axis=1)

    whh = pack256(cat_gates(P['whh_f']), cat_gates(P['whh_b']))    # (H1, 256)
    wih = pack256(cat_gates(P['wih_f']), cat_gates(P['wih_b']))    # (H1, 256)
    bx = pack256(bias_block(P['bih_f'], P['bhh_f']),
                 bias_block(P['bih_b'], P['bhh_b']))               # (1, 256)
    bhn_f = jnp.pad(P['bhh_f'][2], ((0, 0), (0, 256 - H1)))
    bhn_b = jnp.pad(P['bhh_b'][2], ((0, 0), (0, 256 - H1)))
    gw = jnp.concatenate([whh, wih, bx, bhn_f, bhn_b], axis=0)     # (67, 256)
    assert gw.shape == (GW_ROWS, 256), gw.shape

    def pad_lanes(x):
        return jnp.pad(x, ((0, 0), (0, H2 - x.shape[1])))

    ew = jnp.concatenate([
        P['wa_T'],                                           # (H2, H2)
        pad_lanes(P['conv_w'].reshape(3 * H2, NUM_FILTER)),  # 3 taps stacked on rows
        pad_lanes(P['dense_wT']),                            # (3F, H2)
        P['wr'].T,                                           # (1, H2)
        pad_lanes(P['conv_b']),                              # (1, H2)
        pad_lanes(P['dense_b']),                             # (1, H2)
    ], axis=0)                                               # (355, 64)
    assert ew.shape == (EW_ROWS, H2), ew.shape
    return gw, ew


def _full_spec(shape):
    nd = len(shape)
    return pl.BlockSpec(shape, lambda i, _nd=nd: (0,) * _nd)


@jax.jit
def bgwa_pallas(gru_input, wmask, p1, p2, p3, gw, ew):
    # time-major (row = t*B + b) activations / packed masks
    x_tm = jnp.transpose(gru_input, (1, 0, 2)).reshape(S * B, DIN)
    masks = jnp.transpose(jnp.stack([wmask, p1, p2, p3], axis=-1),
                          (1, 0, 2)).reshape(S * B, 4)
    inputs = [x_tm, masks, gw, ew]
    grid_spec = pltpu.PrefetchScalarGridSpec(
        num_scalar_prefetch=0,
        grid=(1,),
        in_specs=[_full_spec(x.shape) for x in inputs],
        out_specs=_full_spec((B, NUM_CLASS)),
        scratch_shapes=[pltpu.VMEM((S * B, H1), jnp.float32),   # fwd GRU outputs
                        pltpu.VMEM((S * B, H1), jnp.float32)])  # bwd GRU outputs
    return pl.pallas_call(
        bgwa_kernel,
        out_shape=jax.ShapeDtypeStruct((B, NUM_CLASS), jnp.float32),
        grid_spec=grid_spec,
        compiler_params=pltpu.CompilerParams(
            dimension_semantics=("arbitrary",)),
    )(*inputs)


# ----------------------------------------------------------------------------
# Pure-JAX reference (same math, HIGHEST precision) for a correctness check.
# ----------------------------------------------------------------------------
def bgwa_reference(gru_input, wmask, p1, p2, p3, P):
    hp = functools.partial(jnp.einsum, precision=lax.Precision.HIGHEST)

    def gru_dir(wih, whh, bih, bhh, reverse):
        h = jnp.zeros((B, H1), jnp.float32)
        outs = [None] * S
        order = range(S - 1, -1, -1) if reverse else range(S)
        for t in order:
            x_t = gru_input[:, t, :]
            r = _sigmoid(hp('bd,dh->bh', x_t, wih[0]) + bih[0]
                         + hp('bh,hk->bk', h, whh[0]) + bhh[0])
            z = _sigmoid(hp('bd,dh->bh', x_t, wih[1]) + bih[1]
                         + hp('bh,hk->bk', h, whh[1]) + bhh[1])
            n = jnp.tanh(hp('bd,dh->bh', x_t, wih[2]) + bih[2]
                         + r * (hp('bh,hk->bk', h, whh[2]) + bhh[2]))
            h = (1.0 - z) * n + z * h
            outs[t] = h
        return jnp.stack(outs, axis=1)                            # (B,S,H1)

    fwd = gru_dir(P['wih_f'], P['whh_f'], P['bih_f'], P['bhh_f'], False)
    bwd = gru_dir(P['wih_b'], P['whh_b'], P['bih_b'], P['bhh_b'], True)
    gru_out = jnp.concatenate([fwd, bwd], axis=-1)

    wmask3 = wmask[:, :, None]
    a = jnp.tanh(hp('bsh,hk->bsk', gru_out, P['wa_T']))
    scores = hp('bsk,ko->bso', a, P['wr'])
    scores = jnp.where(wmask3 > 0, scores, NEG_BIG)
    m = jnp.max(scores, axis=1, keepdims=True)
    e = jnp.exp(scores - m)
    attn = e / jnp.sum(e, axis=1, keepdims=True)
    attn_vecs = gru_out * attn

    inp = attn_vecs * wmask3
    zrow = jnp.zeros((B, 1, H2), jnp.float32)
    x_m1 = jnp.concatenate([zrow, inp[:, :-1, :]], axis=1)
    x_p1 = jnp.concatenate([inp[:, 1:, :], zrow], axis=1)
    conv = (hp('bsc,cf->bsf', x_m1, P['conv_w'][0])
            + hp('bsc,cf->bsf', inp, P['conv_w'][1])
            + hp('bsc,cf->bsf', x_p1, P['conv_w'][2]) + P['conv_b'])

    def piece(pm):
        masked = jnp.where(pm[:, :, None] > 0, conv, NEG_BIG)
        return jnp.tanh(jnp.max(masked, axis=1))

    feats = jnp.concatenate([piece(p1), piece(p2), piece(p3)], axis=1)
    return hp('bf,fc->bc', feats, P['dense_wT']) + P['dense_b']


if __name__ == "__main__":
    key = jax.random.PRNGKey(0)
    ks = jax.random.split(key, 24)

    # ---- deterministic "weights" (synthetic; __init__ shapes) ----
    word_emb = 0.3 * jax.random.normal(ks[0], (WORD_VOCAB, WORD_DIM), jnp.float32)
    word_emb = word_emb.at[0].set(0.0)                 # padding_idx=0
    dist1_emb = 0.3 * jax.random.normal(ks[1], (DIST_VOCAB, DIST_DIM), jnp.float32)
    dist1_emb = dist1_emb.at[0].set(0.0)
    dist2_emb = 0.3 * jax.random.normal(ks[2], (DIST_VOCAB, DIST_DIM), jnp.float32)
    dist2_emb = dist2_emb.at[0].set(0.0)

    def gru_params(k0, k1, k2, k3):
        return (0.2 * jax.random.normal(k0, (3, DIN, H1), jnp.float32),
                0.2 * jax.random.normal(k1, (3, H1, H1), jnp.float32),
                0.1 * jax.random.normal(k2, (3, 1, H1), jnp.float32),
                0.1 * jax.random.normal(k3, (3, 1, H1), jnp.float32))

    wih_f, whh_f, bih_f, bhh_f = gru_params(ks[3], ks[4], ks[5], ks[6])
    wih_b, whh_b, bih_b, bhh_b = gru_params(ks[7], ks[8], ks[9], ks[10])

    params = dict(
        wih_f=wih_f, whh_f=whh_f, bih_f=bih_f, bhh_f=bhh_f,
        wih_b=wih_b, whh_b=whh_b, bih_b=bih_b, bhh_b=bhh_b,
        wa_T=0.2 * jax.random.normal(ks[11], (H2, H2), jnp.float32),
        wr=0.3 * jax.random.normal(ks[12], (H2, 1), jnp.float32),
        conv_w=0.2 * jax.random.normal(ks[13], (3, H2, NUM_FILTER), jnp.float32),
        conv_b=0.1 * jax.random.normal(ks[14], (1, NUM_FILTER), jnp.float32),
        dense_wT=0.3 * jax.random.normal(ks[15], (3 * NUM_FILTER, NUM_CLASS),
                                         jnp.float32),
        dense_b=0.1 * jax.random.normal(ks[16], (1, NUM_CLASS), jnp.float32),
    )

    # ---- deterministic example inputs ----
    words_seq = jax.random.randint(ks[17], (B, S), 1, WORD_VOCAB)
    dist1_seq = jax.random.randint(ks[18], (B, S), 0, DIST_VOCAB)
    dist2_seq = jax.random.randint(ks[19], (B, S), 0, DIST_VOCAB)

    words_mask = jnp.ones((B, S), jnp.float32).at[1, 6:].set(0.0)
    p1_mask = jnp.zeros((B, S), jnp.float32).at[:, 0:3].set(1.0)
    p2_mask = jnp.zeros((B, S), jnp.float32).at[:, 3:6].set(1.0)
    p3_mask = jnp.zeros((B, S), jnp.float32).at[:, 6:8].set(1.0)

    # Embedding lookups (glue, plain JAX); dropout is eval-mode identity.
    gru_input = jnp.concatenate(
        [word_emb[words_seq], dist1_emb[dist1_seq], dist2_emb[dist2_seq]],
        axis=-1).astype(jnp.float32)                            # (B, S, DIN)

    # One-time weight packing (kept out of the per-call jit).
    gw, ew = pack_params(params)

    out = bgwa_pallas(gru_input, words_mask, p1_mask, p2_mask, p3_mask, gw, ew)
    out = jax.block_until_ready(out)

    ref = bgwa_reference(gru_input, words_mask, p1_mask, p2_mask, p3_mask, params)
    max_err = float(jnp.max(jnp.abs(out - ref)))
    assert out.shape == (B, NUM_CLASS), out.shape
    assert max_err < 2e-2, f"mismatch vs reference: {max_err}"

    print("KERNEL_OK")
</pallas_src>

<mosaic_0001>
module attributes {stable_mosaic.version = 11 : i64} {
  func.func @bgwa_kernel(%arg0: i32, %arg1: memref<16x32xf32, #tpu.memory_space<vmem>>, %arg2: memref<16x4xf32, #tpu.memory_space<vmem>>, %arg3: memref<67x256xf32, #tpu.memory_space<vmem>>, %arg4: memref<355x64xf32, #tpu.memory_space<vmem>>, %arg5: memref<2x5xf32, #tpu.memory_space<vmem>>, %arg6: memref<16x32xf32, #tpu.memory_space<vmem>>, %arg7: memref<16x32xf32, #tpu.memory_space<vmem>>) attributes {dimension_semantics = [#tpu.dimension_semantics<arbitrary>], iteration_bounds = array<i64: 1>, scalar_prefetch = 0 : i64, scratch_operands = 2 : i64, tpu.core_type = #tpu.core_type<tc>, window_params = [{pipeline_mode = #tpu.pipeline_mode<synchronous>, transform_indices = @transform_0, window_bounds = array<i64: 16, 32>}, {pipeline_mode = #tpu.pipeline_mode<synchronous>, transform_indices = @transform_1, window_bounds = array<i64: 16, 4>}, {pipeline_mode = #tpu.pipeline_mode<synchronous>, transform_indices = @transform_2, window_bounds = array<i64: 67, 256>}, {pipeline_mode = #tpu.pipeline_mode<synchronous>, transform_indices = @transform_3, window_bounds = array<i64: 355, 64>}, {pipeline_mode = #tpu.pipeline_mode<synchronous>, transform_indices = @transform_4, window_bounds = array<i64: 2, 5>}]} {
    %c0 = arith.constant 0 : index
    %c0_0 = arith.constant 0 : index
    %0 = vector.load %arg3[%c0, %c0_0] : memref<67x256xf32, #tpu.memory_space<vmem>>, vector<32x256xf32>
    %1 = arith.truncf %0 : vector<32x256xf32> to vector<32x256xbf16>
    %c32 = arith.constant 32 : index
    %c0_1 = arith.constant 0 : index
    %2 = vector.load %arg3[%c32, %c0_1] : memref<67x256xf32, #tpu.memory_space<vmem>>, vector<32x256xf32>
    %c64 = arith.constant 64 : index
    %c0_2 = arith.constant 0 : index
    %3 = vector.load %arg3[%c64, %c0_2] : memref<67x256xf32, #tpu.memory_space<vmem>>, vector<1x256xf32>
    %c65 = arith.constant 65 : index
    %c0_3 = arith.constant 0 : index
    %4 = vector.load %arg3[%c65, %c0_3] : memref<67x256xf32, #tpu.memory_space<vmem>>, vector<1x32xf32>
    %5 = vector.shape_cast %4 : vector<1x32xf32> to vector<1x32xf32>
    %6 = vector.broadcast %5 : vector<1x32xf32> to vector<2x32xf32>
    %c66 = arith.constant 66 : index
    %c0_4 = arith.constant 0 : index
    %7 = vector.load %arg3[%c66, %c0_4] : memref<67x256xf32, #tpu.memory_space<vmem>>, vector<1x32xf32>
    %8 = vector.shape_cast %7 : vector<1x32xf32> to vector<1x32xf32>
    %9 = vector.broadcast %8 : vector<1x32xf32> to vector<2x32xf32>
    %10 = tpu.concatenate %6, %9 in 0 : vector<2x32xf32>, vector<2x32xf32> -> vector<4x32xf32>
    %c0_5 = arith.constant 0 : index
    %c0_6 = arith.constant 0 : index
    %11 = vector.load %arg1[%c0_5, %c0_6] : memref<16x32xf32, #tpu.memory_space<vmem>>, vector<16x32xf32>
    %12 = arith.truncf %11 : vector<16x32xf32> to vector<16x32xbf16>
    %13 = arith.truncf %2 : vector<32x256xf32> to vector<32x256xbf16>
    %cst = arith.constant dense<0.000000e+00> : vector<16x256xf32>
    %14 = tpu.matmul %12, %13, %cst {dimension_numbers = #tpu.dot_dimension_numbers<[1], [0], [0], [1], [0, 0, 1, 1], [], []>} : vector<16x32xbf16>, vector<32x256xbf16>, vector<16x256xf32> -> vector<16x256xf32>
    %15 = vector.broadcast %3 : vector<1x256xf32> to vector<16x256xf32>
    %16 = arith.addf %14, %15 : vector<16x256xf32>
    %17 = vector.extract_strided_slice %16 {offsets = [0, 0], sizes = [2, 96], strides = [1, 1]} : vector<16x256xf32> to vector<2x96xf32>
    %18 = vector.extract_strided_slice %16 {offsets = [14, 128], sizes = [2, 96], strides = [1, 1]} : vector<16x256xf32> to vector<2x96xf32>
    %19 = tpu.concatenate %17, %18 in 0 : vector<2x96xf32>, vector<2x96xf32> -> vector<4x96xf32>
    %20 = vector.extract_strided_slice %16 {offsets = [2, 0], sizes = [2, 96], strides = [1, 1]} : vector<16x256xf32> to vector<2x96xf32>
    %21 = vector.extract_strided_slice %16 {offsets = [12, 128], sizes = [2, 96], strides = [1, 1]} : vector<16x256xf32> to vector<2x96xf32>
    %22 = tpu.concatenate %20, %21 in 0 : vector<2x96xf32>, vector<2x96xf32> -> vector<4x96xf32>
    %23 = vector.extract_strided_slice %16 {offsets = [4, 0], sizes = [2, 96], strides = [1, 1]} : vector<16x256xf32> to vector<2x96xf32>
    %24 = vector.extract_strided_slice %16 {offsets = [10, 128], sizes = [2, 96], strides = [1, 1]} : vector<16x256xf32> to vector<2x96xf32>
    %25 = tpu.concatenate %23, %24 in 0 : vector<2x96xf32>, vector<2x96xf32> -> vector<4x96xf32>
    %26 = vector.extract_strided_slice %16 {offsets = [6, 0], sizes = [2, 96], strides = [1, 1]} : vector<16x256xf32> to vector<2x96xf32>
    %27 = vector.extract_strided_slice %16 {offsets = [8, 128], sizes = [2, 96], strides = [1, 1]} : vector<16x256xf32> to vector<2x96xf32>
    %28 = tpu.concatenate %26, %27 in 0 : vector<2x96xf32>, vector<2x96xf32> -> vector<4x96xf32>
    %29 = vector.extract_strided_slice %16 {offsets = [8, 0], sizes = [2, 96], strides = [1, 1]} : vector<16x256xf32> to vector<2x96xf32>
    %30 = vector.extract_strided_slice %16 {offsets = [6, 128], sizes = [2, 96], strides = [1, 1]} : vector<16x256xf32> to vector<2x96xf32>
    %31 = tpu.concatenate %29, %30 in 0 : vector<2x96xf32>, vector<2x96xf32> -> vector<4x96xf32>
    %32 = vector.extract_strided_slice %16 {offsets = [10, 0], sizes = [2, 96], strides = [1, 1]} : vector<16x256xf32> to vector<2x96xf32>
    %33 = vector.extract_strided_slice %16 {offsets = [4, 128], sizes = [2, 96], strides = [1, 1]} : vector<16x256xf32> to vector<2x96xf32>
    %34 = tpu.concatenate %32, %33 in 0 : vector<2x96xf32>, vector<2x96xf32> -> vector<4x96xf32>
    %35 = vector.extract_strided_slice %16 {offsets = [12, 0], sizes = [2, 96], strides = [1, 1]} : vector<16x256xf32> to vector<2x96xf32>
    %36 = vector.extract_strided_slice %16 {offsets = [2, 128], sizes = [2, 96], strides = [1, 1]} : vector<16x256xf32> to vector<2x96xf32>
    %37 = tpu.concatenate %35, %36 in 0 : vector<2x96xf32>, vector<2x96xf32> -> vector<4x96xf32>
    %38 = vector.extract_strided_slice %16 {offsets = [14, 0], sizes = [2, 96], strides = [1, 1]} : vector<16x256xf32> to vector<2x96xf32>
    %39 = vector.extract_strided_slice %16 {offsets = [0, 128], sizes = [2, 96], strides = [1, 1]} : vector<16x256xf32> to vector<2x96xf32>
    %40 = tpu.concatenate %38, %39 in 0 : vector<2x96xf32>, vector<2x96xf32> -> vector<4x96xf32>
    %41 = tpu.iota {dimensions = array<i32: 0>} : vector<4x96xi32>
    %c2_i32 = arith.constant 2 : i32
    %42 = vector.broadcast %c2_i32 : i32 to vector<4x96xi32>
    %43 = arith.cmpi slt, %41, %42 : vector<4x96xi32>
    %cst_7 = arith.constant 0.000000e+00 : f32
    %44 = vector.broadcast %cst_7 : f32 to vector<4x32xf32>
    %45 = arith.truncf %44 : vector<4x32xf32> to vector<4x32xbf16>
    %cst_8 = arith.constant dense<0.000000e+00> : vector<4x256xf32>
    %46 = tpu.matmul %45, %1, %cst_8 {dimension_numbers = #tpu.dot_dimension_numbers<[1], [0], [0], [1], [0, 0, 1, 1], [], []>} : vector<4x32xbf16>, vector<32x256xbf16>, vector<4x256xf32> -> vector<4x256xf32>
    %47 = vector.extract_strided_slice %46 {offsets = [0, 0], sizes = [4, 96], strides = [1, 1]} : vector<4x256xf32> to vector<4x96xf32>
    %48 = vector.extract_strided_slice %46 {offsets = [0, 128], sizes = [4, 96], strides = [1, 1]} : vector<4x256xf32> to vector<4x96xf32>
    %49 = arith.select %43, %47, %48 : vector<4x96xi1>, vector<4x96xf32>
    %50 = vector.extract_strided_slice %19 {offsets = [0, 0], sizes = [4, 64], strides = [1, 1]} : vector<4x96xf32> to vector<4x64xf32>
    %51 = vector.extract_strided_slice %49 {offsets = [0, 0], sizes = [4, 64], strides = [1, 1]} : vector<4x96xf32> to vector<4x64xf32>
    %52 = arith.addf %50, %51 : vector<4x64xf32>
    %cst_9 = arith.constant 5.000000e-01 : f32
    %53 = vector.broadcast %cst_9 : f32 to vector<4x64xf32>
    %54 = arith.mulf %53, %52 : vector<4x64xf32>
    %55 = math.tanh %54 : vector<4x64xf32>
    %cst_10 = arith.constant 1.000000e+00 : f32
    %56 = vector.broadcast %cst_10 : f32 to vector<4x64xf32>
    %57 = arith.addf %55, %56 : vector<4x64xf32>
    %cst_11 = arith.constant 5.000000e-01 : f32
    %58 = vector.broadcast %cst_11 : f32 to vector<4x64xf32>
    %59 = arith.mulf %58, %57 : vector<4x64xf32>
    %60 = vector.extract_strided_slice %59 {offsets = [0, 0], sizes = [4, 32], strides = [1, 1]} : vector<4x64xf32> to vector<4x32xf32>
    %61 = vector.extract_strided_slice %59 {offsets = [0, 32], sizes = [4, 32], strides = [1, 1]} : vector<4x64xf32> to vector<4x32xf32>
    %62 = vector.extract_strided_slice %19 {offsets = [0, 64], sizes = [4, 32], strides = [1, 1]} : vector<4x96xf32> to vector<4x32xf32>
    %63 = vector.extract_strided_slice %49 {offsets = [0, 64], sizes = [4, 32], strides = [1, 1]} : vector<4x96xf32> to vector<4x32xf32>
    %64 = arith.addf %63, %10 : vector<4x32xf32>
    %65 = arith.mulf %60, %64 : vector<4x32xf32>
    %66 = arith.addf %62, %65 : vector<4x32xf32>
    %67 = math.tanh %66 : vector<4x32xf32>
    %cst_12 = arith.constant 1.000000e+00 : f32
    %68 = vector.broadcast %cst_12 : f32 to vector<4x32xf32>
    %69 = arith.subf %68, %61 : vector<4x32xf32>
    %70 = arith.mulf %69, %67 : vector<4x32xf32>
    %71 = arith.mulf %61, %44 : vector<4x32xf32>
    %72 = arith.addf %70, %71 : vector<4x32xf32>
    %73 = vector.extract_strided_slice %72 {offsets = [0, 0], sizes = [2, 32], strides = [1, 1]} : vector<4x32xf32> to vector<2x32xf32>
    %c0_13 = arith.constant 0 : index
    %c0_14 = arith.constant 0 : index
    %74 = vector.load %arg6[%c0_13, %c0_14] : memref<16x32xf32, #tpu.memory_space<vmem>>, vector<2x32xf32>
    tpu.vector_store %arg6[%c0_13, %c0_14], %73 {strides = array<i32>} : memref<16x32xf32, #tpu.memory_space<vmem>>, vector<2x32xf32>,
    %75 = vector.extract_strided_slice %72 {offsets = [2, 0], sizes = [2, 32], strides = [1, 1]} : vector<4x32xf32> to vector<2x32xf32>
    %c14 = arith.constant 14 : index
    %c0_15 = arith.constant 0 : index
    %76 = vector.load %arg7[%c14, %c0_15] : memref<16x32xf32, #tpu.memory_space<vmem>>, vector<2x32xf32>
    tpu.vector_store %arg7[%c14, %c0_15], %75 {strides = array<i32>} : memref<16x32xf32, #tpu.memory_space<vmem>>, vector<2x32xf32>,
    %77 = arith.truncf %72 : vector<4x32xf32> to vector<4x32xbf16>
    %cst_16 = arith.constant dense<0.000000e+00> : vector<4x256xf32>
    %78 = tpu.matmul %77, %1, %cst_16 {dimension_numbers = #tpu.dot_dimension_numbers<[1], [0], [0], [1], [0, 0, 1, 1], [], []>} : vector<4x32xbf16>, vector<32x256xbf16>, vector<4x256xf32> -> vector<4x256xf32>
    %79 = vector.extract_strided_slice %78 {offsets = [0, 0], sizes = [4, 96], strides = [1, 1]} : vector<4x256xf32> to vector<4x96xf32>
    %80 = vector.extract_strided_slice %78 {offsets = [0, 128], sizes = [4, 96], strides = [1, 1]} : vector<4x256xf32> to vector<4x96xf32>
    %81 = arith.select %43, %79, %80 : vector<4x96xi1>, vector<4x96xf32>
    %82 = vector.extract_strided_slice %22 {offsets = [0, 0], sizes = [4, 64], strides = [1, 1]} : vector<4x96xf32> to vector<4x64xf32>
    %83 = vector.extract_strided_slice %81 {offsets = [0, 0], sizes = [4, 64], strides = [1, 1]} : vector<4x96xf32> to vector<4x64xf32>
    %84 = arith.addf %82, %83 : vector<4x64xf32>
    %cst_17 = arith.constant 5.000000e-01 : f32
    %85 = vector.broadcast %cst_17 : f32 to vector<4x64xf32>
    %86 = arith.mulf %85, %84 : vector<4x64xf32>
    %87 = math.tanh %86 : vector<4x64xf32>
    %cst_18 = arith.constant 1.000000e+00 : f32
    %88 = vector.broadcast %cst_18 : f32 to vector<4x64xf32>
    %89 = arith.addf %87, %88 : vector<4x64xf32>
    %cst_19 = arith.constant 5.000000e-01 : f32
    %90 = vector.broadcast %cst_19 : f32 to vector<4x64xf32>
    %91 = arith.mulf %90, %89 : vector<4x64xf32>
    %92 = vector.extract_strided_slice %91 {offsets = [0, 0], sizes = [4, 32], strides = [1, 1]} : vector<4x64xf32> to vector<4x32xf32>
    %93 = vector.extract_strided_slice %91 {offsets = [0, 32], sizes = [4, 32], strides = [1, 1]} : vector<4x64xf32> to vector<4x32xf32>
    %94 = vector.extract_strided_slice %22 {offsets = [0, 64], sizes = [4, 32], strides = [1, 1]} : vector<4x96xf32> to vector<4x32xf32>
    %95 = vector.extract_strided_slice %81 {offsets = [0, 64], sizes = [4, 32], strides = [1, 1]} : vector<4x96xf32> to vector<4x32xf32>
    %96 = arith.addf %95, %10 : vector<4x32xf32>
    %97 = arith.mulf %92, %96 : vector<4x32xf32>
    %98 = arith.addf %94, %97 : vector<4x32xf32>
    %99 = math.tanh %98 : vector<4x32xf32>
    %cst_20 = arith.constant 1.000000e+00 : f32
    %100 = vector.broadcast %cst_20 : f32 to vector<4x32xf32>
    %101 = arith.subf %100, %93 : vector<4x32xf32>
    %102 = arith.mulf %101, %99 : vector<4x32xf32>
    %103 = arith.mulf %93, %72 : vector<4x32xf32>
    %104 = arith.addf %102, %103 : vector<4x32xf32>
    %105 = vector.extract_strided_slice %104 {offsets = [0, 0], sizes = [2, 32], strides = [1, 1]} : vector<4x32xf32> to vector<2x32xf32>
    %c2 = arith.constant 2 : index
    %c0_21 = arith.constant 0 : index
    %106 = vector.load %arg6[%c2, %c0_21] : memref<16x32xf32, #tpu.memory_space<vmem>>, vector<2x32xf32>
    tpu.vector_store %arg6[%c2, %c0_21], %105 {strides = array<i32>} : memref<16x32xf32, #tpu.memory_space<vmem>>, vector<2x32xf32>,
    %107 = vector.extract_strided_slice %104 {offsets = [2, 0], sizes = [2, 32], strides = [1, 1]} : vector<4x32xf32> to vector<2x32xf32>
    %c12 = arith.constant 12 : index
    %c0_22 = arith.constant 0 : index
    %108 = vector.load %arg7[%c12, %c0_22] : memref<16x32xf32, #tpu.memory_space<vmem>>, vector<2x32xf32>
    tpu.vector_store %arg7[%c12, %c0_22], %107 {strides = array<i32>} : memref<16x32xf32, #tpu.memory_space<vmem>>, vector<2x32xf32>,
    %109 = arith.truncf %104 : vector<4x32xf32> to vector<4x32xbf16>
    %cst_23 = arith.constant dense<0.000000e+00> : vector<4x256xf32>
    %110 = tpu.matmul %109, %1, %cst_23 {dimension_numbers = #tpu.dot_dimension_numbers<[1], [0], [0], [1], [0, 0, 1, 1], [], []>} : vector<4x32xbf16>, vector<32x256xbf16>, vector<4x256xf32> -> vector<4x256xf32>
    %111 = vector.extract_strided_slice %110 {offsets = [0, 0], sizes = [4, 96], strides = [1, 1]} : vector<4x256xf32> to vector<4x96xf32>
    %112 = vector.extract_strided_slice %110 {offsets = [0, 128], sizes = [4, 96], strides = [1, 1]} : vector<4x256xf32> to vector<4x96xf32>
    %113 = arith.select %43, %111, %112 : vector<4x96xi1>, vector<4x96xf32>
    %114 = vector.extract_strided_slice %25 {offsets = [0, 0], sizes = [4, 64], strides = [1, 1]} : vector<4x96xf32> to vector<4x64xf32>
    %115 = vector.extract_strided_slice %113 {offsets = [0, 0], sizes = [4, 64], strides = [1, 1]} : vector<4x96xf32> to vector<4x64xf32>
    %116 = arith.addf %114, %115 : vector<4x64xf32>
    %cst_24 = arith.constant 5.000000e-01 : f32
    %117 = vector.broadcast %cst_24 : f32 to vector<4x64xf32>
    %118 = arith.mulf %117, %116 : vector<4x64xf32>
    %119 = math.tanh %118 : vector<4x64xf32>
    %cst_25 = arith.constant 1.000000e+00 : f32
    %120 = vector.broadcast %cst_25 : f32 to vector<4x64xf32>
    %121 = arith.addf %119, %120 : vector<4x64xf32>
    %cst_26 = arith.constant 5.000000e-01 : f32
    %122 = vector.broadcast %cst_26 : f32 to vector<4x64xf32>
    %123 = arith.mulf %122, %121 : vector<4x64xf32>
    %124 = vector.extract_strided_slice %123 {offsets = [0, 0], sizes = [4, 32], strides = [1, 1]} : vector<4x64xf32> to vector<4x32xf32>
    %125 = vector.extract_strided_slice %123 {offsets = [0, 32], sizes = [4, 32], strides = [1, 1]} : vector<4x64xf32> to vector<4x32xf32>
    %126 = vector.extract_strided_slice %25 {offsets = [0, 64], sizes = [4, 32], strides = [1, 1]} : vector<4x96xf32> to vector<4x32xf32>
    %127 = vector.extract_strided_slice %113 {offsets = [0, 64], sizes = [4, 32], strides = [1, 1]} : vector<4x96xf32> to vector<4x32xf32>
    %128 = arith.addf %127, %10 : vector<4x32xf32>
    %129 = arith.mulf %124, %128 : vector<4x32xf32>
    %130 = arith.addf %126, %129 : vector<4x32xf32>
    %131 = math.tanh %130 : vector<4x32xf32>
    %cst_27 = arith.constant 1.000000e+00 : f32
    %132 = vector.broadcast %cst_27 : f32 to vector<4x32xf32>
    %133 = arith.subf %132, %125 : vector<4x32xf32>
    %134 = arith.mulf %133, %131 : vector<4x32xf32>
    %135 = arith.mulf %125, %104 : vector<4x32xf32>
    %136 = arith.addf %134, %135 : vector<4x32xf32>
    %137 = vector.extract_strided_slice %136 {offsets = [0, 0], sizes = [2, 32], strides = [1, 1]} : vector<4x32xf32> to vector<2x32xf32>
    %c4 = arith.constant 4 : index
    %c0_28 = arith.constant 0 : index
    %138 = vector.load %arg6[%c4, %c0_28] : memref<16x32xf32, #tpu.memory_space<vmem>>, vector<2x32xf32>
    tpu.vector_store %arg6[%c4, %c0_28], %137 {strides = array<i32>} : memref<16x32xf32, #tpu.memory_space<vmem>>, vector<2x32xf32>,
    %139 = vector.extract_strided_slice %136 {offsets = [2, 0], sizes = [2, 32], strides = [1, 1]} : vector<4x32xf32> to vector<2x32xf32>
    %c10 = arith.constant 10 : index
    %c0_29 = arith.constant 0 : index
    %140 = vector.load %arg7[%c10, %c0_29] : memref<16x32xf32, #tpu.memory_space<vmem>>, vector<2x32xf32>
    tpu.vector_store %arg7[%c10, %c0_29], %139 {strides = array<i32>} : memref<16x32xf32, #tpu.memory_space<vmem>>, vector<2x32xf32>,
    %141 = arith.truncf %136 : vector<4x32xf32> to vector<4x32xbf16>
    %cst_30 = arith.constant dense<0.000000e+00> : vector<4x256xf32>
    %142 = tpu.matmul %141, %1, %cst_30 {dimension_numbers = #tpu.dot_dimension_numbers<[1], [0], [0], [1], [0, 0, 1, 1], [], []>} : vector<4x32xbf16>, vector<32x256xbf16>, vector<4x256xf32> -> vector<4x256xf32>
    %143 = vector.extract_strided_slice %142 {offsets = [0, 0], sizes = [4, 96], strides = [1, 1]} : vector<4x256xf32> to vector<4x96xf32>
    %144 = vector.extract_strided_slice %142 {offsets = [0, 128], sizes = [4, 96], strides = [1, 1]} : vector<4x256xf32> to vector<4x96xf32>
    %145 = arith.select %43, %143, %144 : vector<4x96xi1>, vector<4x96xf32>
    %146 = vector.extract_strided_slice %28 {offsets = [0, 0], sizes = [4, 64], strides = [1, 1]} : vector<4x96xf32> to vector<4x64xf32>
    %147 = vector.extract_strided_slice %145 {offsets = [0, 0], sizes = [4, 64], strides = [1, 1]} : vector<4x96xf32> to vector<4x64xf32>
    %148 = arith.addf %146, %147 : vector<4x64xf32>
    %cst_31 = arith.constant 5.000000e-01 : f32
    %149 = vector.broadcast %cst_31 : f32 to vector<4x64xf32>
    %150 = arith.mulf %149, %148 : vector<4x64xf32>
    %151 = math.tanh %150 : vector<4x64xf32>
    %cst_32 = arith.constant 1.000000e+00 : f32
    %152 = vector.broadcast %cst_32 : f32 to vector<4x64xf32>
    %153 = arith.addf %151, %152 : vector<4x64xf32>
    %cst_33 = arith.constant 5.000000e-01 : f32
    %154 = vector.broadcast %cst_33 : f32 to vector<4x64xf32>
    %155 = arith.mulf %154, %153 : vector<4x64xf32>
    %156 = vector.extract_strided_slice %155 {offsets = [0, 0], sizes = [4, 32], strides = [1, 1]} : vector<4x64xf32> to vector<4x32xf32>
    %157 = vector.extract_strided_slice %155 {offsets = [0, 32], sizes = [4, 32], strides = [1, 1]} : vector<4x64xf32> to vector<4x32xf32>
    %158 = vector.extract_strided_slice %28 {offsets = [0, 64], sizes = [4, 32], strides = [1, 1]} : vector<4x96xf32> to vector<4x32xf32>
    %159 = vector.extract_strided_slice %145 {offsets = [0, 64], sizes = [4, 32], strides = [1, 1]} : vector<4x96xf32> to vector<4x32xf32>
    %160 = arith.addf %159, %10 : vector<4x32xf32>
    %161 = arith.mulf %156, %160 : vector<4x32xf32>
    %162 = arith.addf %158, %161 : vector<4x32xf32>
    %163 = math.tanh %162 : vector<4x32xf32>
    %cst_34 = arith.constant 1.000000e+00 : f32
    %164 = vector.broadcast %cst_34 : f32 to vector<4x32xf32>
    %165 = arith.subf %164, %157 : vector<4x32xf32>
    %166 = arith.mulf %165, %163 : vector<4x32xf32>
    %167 = arith.mulf %157, %136 : vector<4x32xf32>
    %168 = arith.addf %166, %167 : vector<4x32xf32>
    %169 = vector.extract_strided_slice %168 {offsets = [0, 0], sizes = [2, 32], strides = [1, 1]} : vector<4x32xf32> to vector<2x32xf32>
    %c6 = arith.constant 6 : index
    %c0_35 = arith.constant 0 : index
    %170 = vector.load %arg6[%c6, %c0_35] : memref<16x32xf32, #tpu.memory_space<vmem>>, vector<2x32xf32>
    tpu.vector_store %arg6[%c6, %c0_35], %169 {strides = array<i32>} : memref<16x32xf32, #tpu.memory_space<vmem>>, vector<2x32xf32>,
    %171 = vector.extract_strided_slice %168 {offsets = [2, 0], sizes = [2, 32], strides = [1, 1]} : vector<4x32xf32> to vector<2x32xf32>
    %c8 = arith.constant 8 : index
    %c0_36 = arith.constant 0 : index
    %172 = vector.load %arg7[%c8, %c0_36] : memref<16x32xf32, #tpu.memory_space<vmem>>, vector<2x32xf32>
    tpu.vector_store %arg7[%c8, %c0_36], %171 {strides = array<i32>} : memref<16x32xf32, #tpu.memory_space<vmem>>, vector<2x32xf32>,
    %173 = arith.truncf %168 : vector<4x32xf32> to vector<4x32xbf16>
    %cst_37 = arith.constant dense<0.000000e+00> : vector<4x256xf32>
    %174 = tpu.matmul %173, %1, %cst_37 {dimension_numbers = #tpu.dot_dimension_numbers<[1], [0], [0], [1], [0, 0, 1, 1], [], []>} : vector<4x32xbf16>, vector<32x256xbf16>, vector<4x256xf32> -> vector<4x256xf32>
    %175 = vector.extract_strided_slice %174 {offsets = [0, 0], sizes = [4, 96], strides = [1, 1]} : vector<4x256xf32> to vector<4x96xf32>
    %176 = vector.extract_strided_slice %174 {offsets = [0, 128], sizes = [4, 96], strides = [1, 1]} : vector<4x256xf32> to vector<4x96xf32>
    %177 = arith.select %43, %175, %176 : vector<4x96xi1>, vector<4x96xf32>
    %178 = vector.extract_strided_slice %31 {offsets = [0, 0], sizes = [4, 64], strides = [1, 1]} : vector<4x96xf32> to vector<4x64xf32>
    %179 = vector.extract_strided_slice %177 {offsets = [0, 0], sizes = [4, 64], strides = [1, 1]} : vector<4x96xf32> to vector<4x64xf32>
    %180 = arith.addf %178, %179 : vector<4x64xf32>
    %cst_38 = arith.constant 5.000000e-01 : f32
    %181 = vector.broadcast %cst_38 : f32 to vector<4x64xf32>
    %182 = arith.mulf %181, %180 : vector<4x64xf32>
    %183 = math.tanh %182 : vector<4x64xf32>
    %cst_39 = arith.constant 1.000000e+00 : f32
    %184 = vector.broadcast %cst_39 : f32 to vector<4x64xf32>
    %185 = arith.addf %183, %184 : vector<4x64xf32>
    %cst_40 = arith.constant 5.000000e-01 : f32
    %186 = vector.broadcast %cst_40 : f32 to vector<4x64xf32>
    %187 = arith.mulf %186, %185 : vector<4x64xf32>
    %188 = vector.extract_strided_slice %187 {offsets = [0, 0], sizes = [4, 32], strides = [1, 1]} : vector<4x64xf32> to vector<4x32xf32>
    %189 = vector.extract_strided_slice %187 {offsets = [0, 32], sizes = [4, 32], strides = [1, 1]} : vector<4x64xf32> to vector<4x32xf32>
    %190 = vector.extract_strided_slice %31 {offsets = [0, 64], sizes = [4, 32], strides = [1, 1]} : vector<4x96xf32> to vector<4x32xf32>
    %191 = vector.extract_strided_slice %177 {offsets = [0, 64], sizes = [4, 32], strides = [1, 1]} : vector<4x96xf32> to vector<4x32xf32>
    %192 = arith.addf %191, %10 : vector<4x32xf32>
    %193 = arith.mulf %188, %192 : vector<4x32xf32>
    %194 = arith.addf %190, %193 : vector<4x32xf32>
    %195 = math.tanh %194 : vector<4x32xf32>
    %cst_41 = arith.constant 1.000000e+00 : f32
    %196 = vector.broadcast %cst_41 : f32 to vector<4x32xf32>
    %197 = arith.subf %196, %189 : vector<4x32xf32>
    %198 = arith.mulf %197, %195 : vector<4x32xf32>
    %199 = arith.mulf %189, %168 : vector<4x32xf32>
    %200 = arith.addf %198, %199 : vector<4x32xf32>
    %201 = vector.extract_strided_slice %200 {offsets = [0, 0], sizes = [2, 32], strides = [1, 1]} : vector<4x32xf32> to vector<2x32xf32>
    %c8_42 = arith.constant 8 : index
    %c0_43 = arith.constant 0 : index
    %202 = vector.load %arg6[%c8_42, %c0_43] : memref<16x32xf32, #tpu.memory_space<vmem>>, vector<2x32xf32>
    tpu.vector_store %arg6[%c8_42, %c0_43], %201 {strides = array<i32>} : memref<16x32xf32, #tpu.memory_space<vmem>>, vector<2x32xf32>,
    %203 = vector.extract_strided_slice %200 {offsets = [2, 0], sizes = [2, 32], strides = [1, 1]} : vector<4x32xf32> to vector<2x32xf32>
    %c6_44 = arith.constant 6 : index
    %c0_45 = arith.constant 0 : index
    %204 = vector.load %arg7[%c6_44, %c0_45] : memref<16x32xf32, #tpu.memory_space<vmem>>, vector<2x32xf32>
    tpu.vector_store %arg7[%c6_44, %c0_45], %203 {strides = array<i32>} : memref<16x32xf32, #tpu.memory_space<vmem>>, vector<2x32xf32>,
    %205 = arith.truncf %200 : vector<4x32xf32> to vector<4x32xbf16>
    %cst_46 = arith.constant dense<0.000000e+00> : vector<4x256xf32>
    %206 = tpu.matmul %205, %1, %cst_46 {dimension_numbers = #tpu.dot_dimension_numbers<[1], [0], [0], [1], [0, 0, 1, 1], [], []>} : vector<4x32xbf16>, vector<32x256xbf16>, vector<4x256xf32> -> vector<4x256xf32>
    %207 = vector.extract_strided_slice %206 {offsets = [0, 0], sizes = [4, 96], strides = [1, 1]} : vector<4x256xf32> to vector<4x96xf32>
    %208 = vector.extract_strided_slice %206 {offsets = [0, 128], sizes = [4, 96], strides = [1, 1]} : vector<4x256xf32> to vector<4x96xf32>
    %209 = arith.select %43, %207, %208 : vector<4x96xi1>, vector<4x96xf32>
    %210 = vector.extract_strided_slice %34 {offsets = [0, 0], sizes = [4, 64], strides = [1, 1]} : vector<4x96xf32> to vector<4x64xf32>
    %211 = vector.extract_strided_slice %209 {offsets = [0, 0], sizes = [4, 64], strides = [1, 1]} : vector<4x96xf32> to vector<4x64xf32>
    %212 = arith.addf %210, %211 : vector<4x64xf32>
    %cst_47 = arith.constant 5.000000e-01 : f32
    %213 = vector.broadcast %cst_47 : f32 to vector<4x64xf32>
    %214 = arith.mulf %213, %212 : vector<4x64xf32>
    %215 = math.tanh %214 : vector<4x64xf32>
    %cst_48 = arith.constant 1.000000e+00 : f32
    %216 = vector.broadcast %cst_48 : f32 to vector<4x64xf32>
    %217 = arith.addf %215, %216 : vector<4x64xf32>
    %cst_49 = arith.constant 5.000000e-01 : f32
    %218 = vector.broadcast %cst_49 : f32 to vector<4x64xf32>
    %219 = arith.mulf %218, %217 : vector<4x64xf32>
    %220 = vector.extract_strided_slice %219 {offsets = [0, 0], sizes = [4, 32], strides = [1, 1]} : vector<4x64xf32> to vector<4x32xf32>
    %221 = vector.extract_strided_slice %219 {offsets = [0, 32], sizes = [4, 32], strides = [1, 1]} : vector<4x64xf32> to vector<4x32xf32>
    %222 = vector.extract_strided_slice %34 {offsets = [0, 64], sizes = [4, 32], strides = [1, 1]} : vector<4x96xf32> to vector<4x32xf32>
    %223 = vector.extract_strided_slice %209 {offsets = [0, 64], sizes = [4, 32], strides = [1, 1]} : vector<4x96xf32> to vector<4x32xf32>
    %224 = arith.addf %223, %10 : vector<4x32xf32>
    %225 = arith.mulf %220, %224 : vector<4x32xf32>
    %226 = arith.addf %222, %225 : vector<4x32xf32>
    %227 = math.tanh %226 : vector<4x32xf32>
    %cst_50 = arith.constant 1.000000e+00 : f32
    %228 = vector.broadcast %cst_50 : f32 to vector<4x32xf32>
    %229 = arith.subf %228, %221 : vector<4x32xf32>
    %230 = arith.mulf %229, %227 : vector<4x32xf32>
    %231 = arith.mulf %221, %200 : vector<4x32xf32>
    %232 = arith.addf %230, %231 : vector<4x32xf32>
    %233 = vector.extract_strided_slice %232 {offsets = [0, 0], sizes = [2, 32], strides = [1, 1]} : vector<4x32xf32> to vector<2x32xf32>
    %c10_51 = arith.constant 10 : index
    %c0_52 = arith.constant 0 : index
    %234 = vector.load %arg6[%c10_51, %c0_52] : memref<16x32xf32, #tpu.memory_space<vmem>>, vector<2x32xf32>
    tpu.vector_store %arg6[%c10_51, %c0_52], %233 {strides = array<i32>} : memref<16x32xf32, #tpu.memory_space<vmem>>, vector<2x32xf32>,
    %235 = vector.extract_strided_slice %232 {offsets = [2, 0], sizes = [2, 32], strides = [1, 1]} : vector<4x32xf32> to vector<2x32xf32>
    %c4_53 = arith.constant 4 : index
    %c0_54 = arith.constant 0 : index
    %236 = vector.load %arg7[%c4_53, %c0_54] : memref<16x32xf32, #tpu.memory_space<vmem>>, vector<2x32xf32>
    tpu.vector_store %arg7[%c4_53, %c0_54], %235 {strides = array<i32>} : memref<16x32xf32, #tpu.memory_space<vmem>>, vector<2x32xf32>,
    %237 = arith.truncf %232 : vector<4x32xf32> to vector<4x32xbf16>
    %cst_55 = arith.constant dense<0.000000e+00> : vector<4x256xf32>
    %238 = tpu.matmul %237, %1, %cst_55 {dimension_numbers = #tpu.dot_dimension_numbers<[1], [0], [0], [1], [0, 0, 1, 1], [], []>} : vector<4x32xbf16>, vector<32x256xbf16>, vector<4x256xf32> -> vector<4x256xf32>
    %239 = vector.extract_strided_slice %238 {offsets = [0, 0], sizes = [4, 96], strides = [1, 1]} : vector<4x256xf32> to vector<4x96xf32>
    %240 = vector.extract_strided_slice %238 {offsets = [0, 128], sizes = [4, 96], strides = [1, 1]} : vector<4x256xf32> to vector<4x96xf32>
    %241 = arith.select %43, %239, %240 : vector<4x96xi1>, vector<4x96xf32>
    %242 = vector.extract_strided_slice %37 {offsets = [0, 0], sizes = [4, 64], strides = [1, 1]} : vector<4x96xf32> to vector<4x64xf32>
    %243 = vector.extract_strided_slice %241 {offsets = [0, 0], sizes = [4, 64], strides = [1, 1]} : vector<4x96xf32> to vector<4x64xf32>
    %244 = arith.addf %242, %243 : vector<4x64xf32>
    %cst_56 = arith.constant 5.000000e-01 : f32
    %245 = vector.broadcast %cst_56 : f32 to vector<4x64xf32>
    %246 = arith.mulf %245, %244 : vector<4x64xf32>
    %247 = math.tanh %246 : vector<4x64xf32>
    %cst_57 = arith.constant 1.000000e+00 : f32
    %248 = vector.broadcast %cst_57 : f32 to vector<4x64xf32>
    %249 = arith.addf %247, %248 : vector<4x64xf32>
    %cst_58 = arith.constant 5.000000e-01 : f32
    %250 = vector.broadcast %cst_58 : f32 to vector<4x64xf32>
    %251 = arith.mulf %250, %249 : vector<4x64xf32>
    %252 = vector.extract_strided_slice %251 {offsets = [0, 0], sizes = [4, 32], strides = [1, 1]} : vector<4x64xf32> to vector<4x32xf32>
    %253 = vector.extract_strided_slice %251 {offsets = [0, 32], sizes = [4, 32], strides = [1, 1]} : vector<4x64xf32> to vector<4x32xf32>
    %254 = vector.extract_strided_slice %37 {offsets = [0, 64], sizes = [4, 32], strides = [1, 1]} : vector<4x96xf32> to vector<4x32xf32>
    %255 = vector.extract_strided_slice %241 {offsets = [0, 64], sizes = [4, 32], strides = [1, 1]} : vector<4x96xf32> to vector<4x32xf32>
    %256 = arith.addf %255, %10 : vector<4x32xf32>
    %257 = arith.mulf %252, %256 : vector<4x32xf32>
    %258 = arith.addf %254, %257 : vector<4x32xf32>
    %259 = math.tanh %258 : vector<4x32xf32>
    %cst_59 = arith.constant 1.000000e+00 : f32
    %260 = vector.broadcast %cst_59 : f32 to vector<4x32xf32>
    %261 = arith.subf %260, %253 : vector<4x32xf32>
    %262 = arith.mulf %261, %259 : vector<4x32xf32>
    %263 = arith.mulf %253, %232 : vector<4x32xf32>
    %264 = arith.addf %262, %263 : vector<4x32xf32>
    %265 = vector.extract_strided_slice %264 {offsets = [0, 0], sizes = [2, 32], strides = [1, 1]} : vector<4x32xf32> to vector<2x32xf32>
    %c12_60 = arith.constant 12 : index
    %c0_61 = arith.constant 0 : index
    %266 = vector.load %arg6[%c12_60, %c0_61] : memref<16x32xf32, #tpu.memory_space<vmem>>, vector<2x32xf32>
    tpu.vector_store %arg6[%c12_60, %c0_61], %265 {strides = array<i32>} : memref<16x32xf32, #tpu.memory_space<vmem>>, vector<2x32xf32>,
    %267 = vector.extract_strided_slice %264 {offsets = [2, 0], sizes = [2, 32], strides = [1, 1]} : vector<4x32xf32> to vector<2x32xf32>
    %c2_62 = arith.constant 2 : index
    %c0_63 = arith.constant 0 : index
    %268 = vector.load %arg7[%c2_62, %c0_63] : memref<16x32xf32, #tpu.memory_space<vmem>>, vector<2x32xf32>
    tpu.vector_store %arg7[%c2_62, %c0_63], %267 {strides = array<i32>} : memref<16x32xf32, #tpu.memory_space<vmem>>, vector<2x32xf32>,
    %269 = arith.truncf %264 : vector<4x32xf32> to vector<4x32xbf16>
    %cst_64 = arith.constant dense<0.000000e+00> : vector<4x256xf32>
    %270 = tpu.matmul %269, %1, %cst_64 {dimension_numbers = #tpu.dot_dimension_numbers<[1], [0], [0], [1], [0, 0, 1, 1], [], []>} : vector<4x32xbf16>, vector<32x256xbf16>, vector<4x256xf32> -> vector<4x256xf32>
    %271 = vector.extract_strided_slice %270 {offsets = [0, 0], sizes = [4, 96], strides = [1, 1]} : vector<4x256xf32> to vector<4x96xf32>
    %272 = vector.extract_strided_slice %270 {offsets = [0, 128], sizes = [4, 96], strides = [1, 1]} : vector<4x256xf32> to vector<4x96xf32>
    %273 = arith.select %43, %271, %272 : vector<4x96xi1>, vector<4x96xf32>
    %274 = vector.extract_strided_slice %40 {offsets = [0, 0], sizes = [4, 64], strides = [1, 1]} : vector<4x96xf32> to vector<4x64xf32>
    %275 = vector.extract_strided_slice %273 {offsets = [0, 0], sizes = [4, 64], strides = [1, 1]} : vector<4x96xf32> to vector<4x64xf32>
    %276 = arith.addf %274, %275 : vector<4x64xf32>
    %cst_65 = arith.constant 5.000000e-01 : f32
    %277 = vector.broadcast %cst_65 : f32 to vector<4x64xf32>
    %278 = arith.mulf %277, %276 : vector<4x64xf32>
    %279 = math.tanh %278 : vector<4x64xf32>
    %cst_66 = arith.constant 1.000000e+00 : f32
    %280 = vector.broadcast %cst_66 : f32 to vector<4x64xf32>
    %281 = arith.addf %279, %280 : vector<4x64xf32>
    %cst_67 = arith.constant 5.000000e-01 : f32
    %282 = vector.broadcast %cst_67 : f32 to vector<4x64xf32>
    %283 = arith.mulf %282, %281 : vector<4x64xf32>
    %284 = vector.extract_strided_slice %283 {offsets = [0, 0], sizes = [4, 32], strides = [1, 1]} : vector<4x64xf32> to vector<4x32xf32>
    %285 = vector.extract_strided_slice %283 {offsets = [0, 32], sizes = [4, 32], strides = [1, 1]} : vector<4x64xf32> to vector<4x32xf32>
    %286 = vector.extract_strided_slice %40 {offsets = [0, 64], sizes = [4, 32], strides = [1, 1]} : vector<4x96xf32> to vector<4x32xf32>
    %287 = vector.extract_strided_slice %273 {offsets = [0, 64], sizes = [4, 32], strides = [1, 1]} : vector<4x96xf32> to vector<4x32xf32>
    %288 = arith.addf %287, %10 : vector<4x32xf32>
    %289 = arith.mulf %284, %288 : vector<4x32xf32>
    %290 = arith.addf %286, %289 : vector<4x32xf32>
    %291 = math.tanh %290 : vector<4x32xf32>
    %cst_68 = arith.constant 1.000000e+00 : f32
    %292 = vector.broadcast %cst_68 : f32 to vector<4x32xf32>
    %293 = arith.subf %292, %285 : vector<4x32xf32>
    %294 = arith.mulf %293, %291 : vector<4x32xf32>
    %295 = arith.mulf %285, %264 : vector<4x32xf32>
    %296 = arith.addf %294, %295 : vector<4x32xf32>
    %297 = vector.extract_strided_slice %296 {offsets = [0, 0], sizes = [2, 32], strides = [1, 1]} : vector<4x32xf32> to vector<2x32xf32>
    %c14_69 = arith.constant 14 : index
    %c0_70 = arith.constant 0 : index
    %298 = vector.load %arg6[%c14_69, %c0_70] : memref<16x32xf32, #tpu.memory_space<vmem>>, vector<2x32xf32>
    tpu.vector_store %arg6[%c14_69, %c0_70], %297 {strides = array<i32>} : memref<16x32xf32, #tpu.memory_space<vmem>>, vector<2x32xf32>,
    %299 = vector.extract_strided_slice %296 {offsets = [2, 0], sizes = [2, 32], strides = [1, 1]} : vector<4x32xf32> to vector<2x32xf32>
    %c0_71 = arith.constant 0 : index
    %c0_72 = arith.constant 0 : index
    %300 = vector.load %arg7[%c0_71, %c0_72] : memref<16x32xf32, #tpu.memory_space<vmem>>, vector<2x32xf32>
    tpu.vector_store %arg7[%c0_71, %c0_72], %299 {strides = array<i32>} : memref<16x32xf32, #tpu.memory_space<vmem>>, vector<2x32xf32>,
    %c0_73 = arith.constant 0 : index
    %c0_74 = arith.constant 0 : index
    %301 = vector.load %arg6[%c0_73, %c0_74] : memref<16x32xf32, #tpu.memory_space<vmem>>, vector<16x32xf32>
    %c0_75 = arith.constant 0 : index
    %c0_76 = arith.constant 0 : index
    %302 = vector.load %arg7[%c0_75, %c0_76] : memref<16x32xf32, #tpu.memory_space<vmem>>, vector<16x32xf32>
    %303 = tpu.concatenate %301, %302 in 1 : vector<16x32xf32>, vector<16x32xf32> -> vector<16x64xf32>
    %c0_77 = arith.constant 0 : index
    %c0_78 = arith.constant 0 : index
    %304 = vector.load %arg2[%c0_77, %c0_78] : memref<16x4xf32, #tpu.memory_space<vmem>>, vector<16x1xf32>
    %c0_79 = arith.constant 0 : index
    %c0_80 = arith.constant 0 : index
    %305 = vector.load %arg4[%c0_79, %c0_80] : memref<355x64xf32, #tpu.memory_space<vmem>>, vector<64x64xf32>
    %306 = arith.truncf %303 : vector<16x64xf32> to vector<16x64xbf16>
    %307 = arith.truncf %305 : vector<64x64xf32> to vector<64x64xbf16>
    %cst_81 = arith.constant dense<0.000000e+00> : vector<16x64xf32>
    %308 = tpu.matmul %306, %307, %cst_81 {dimension_numbers = #tpu.dot_dimension_numbers<[1], [0], [0], [1], [0, 0, 1, 1], [], []>} : vector<16x64xbf16>, vector<64x64xbf16>, vector<16x64xf32> -> vector<16x64xf32>
    %309 = math.tanh %308 : vector<16x64xf32>
    %c352 = arith.constant 352 : index
    %c0_82 = arith.constant 0 : index
    %310 = vector.load %arg4[%c352, %c0_82] : memref<355x64xf32, #tpu.memory_space<vmem>>, vector<1x64xf32>
    %311 = vector.broadcast %310 : vector<1x64xf32> to vector<16x64xf32>
    %312 = arith.mulf %309, %311 : vector<16x64xf32>
    %cst_83 = arith.constant dense<0.000000e+00> : vector<16xf32>
    %313 = vector.multi_reduction <add>, %312, %cst_83 [1] : vector<16x64xf32> to vector<16xf32>
    %314 = vector.shape_cast %313 : vector<16xf32> to vector<16x1xf32>
    %cst_84 = arith.constant 0.000000e+00 : f32
    %315 = vector.broadcast %cst_84 : f32 to vector<16x1xf32>
    %316 = arith.cmpf ogt, %304, %315 : vector<16x1xf32>
    %cst_85 = arith.constant -1.000000e+30 : f32
    %317 = vector.broadcast %cst_85 : f32 to vector<16x1xf32>
    %318 = arith.select %316, %314, %317 : vector<16x1xi1>, vector<16x1xf32>
    %319 = vector.extract_strided_slice %318 {offsets = [0, 0], sizes = [2, 1], strides = [1, 1]} : vector<16x1xf32> to vector<2x1xf32>
    %320 = vector.extract_strided_slice %318 {offsets = [2, 0], sizes = [2, 1], strides = [1, 1]} : vector<16x1xf32> to vector<2x1xf32>
    %321 = arith.maximumf %319, %320 : vector<2x1xf32>
    %322 = vector.extract_strided_slice %318 {offsets = [4, 0], sizes = [2, 1], strides = [1, 1]} : vector<16x1xf32> to vector<2x1xf32>
    %323 = arith.maximumf %321, %322 : vector<2x1xf32>
    %324 = vector.extract_strided_slice %318 {offsets = [6, 0], sizes = [2, 1], strides = [1, 1]} : vector<16x1xf32> to vector<2x1xf32>
    %325 = arith.maximumf %323, %324 : vector<2x1xf32>
    %326 = vector.extract_strided_slice %318 {offsets = [8, 0], sizes = [2, 1], strides = [1, 1]} : vector<16x1xf32> to vector<2x1xf32>
    %327 = arith.maximumf %325, %326 : vector<2x1xf32>
    %328 = vector.extract_strided_slice %318 {offsets = [10, 0], sizes = [2, 1], strides = [1, 1]} : vector<16x1xf32> to vector<2x1xf32>
    %329 = arith.maximumf %327, %328 : vector<2x1xf32>
    %330 = vector.extract_strided_slice %318 {offsets = [12, 0], sizes = [2, 1], strides = [1, 1]} : vector<16x1xf32> to vector<2x1xf32>
    %331 = arith.maximumf %329, %330 : vector<2x1xf32>
    %332 = vector.extract_strided_slice %318 {offsets = [14, 0], sizes = [2, 1], strides = [1, 1]} : vector<16x1xf32> to vector<2x1xf32>
    %333 = arith.maximumf %331, %332 : vector<2x1xf32>
    %334 = tpu.concatenate %333, %333, %333, %333, %333, %333, %333, %333 in 0 : vector<2x1xf32>, vector<2x1xf32>, vector<2x1xf32>, vector<2x1xf32>, vector<2x1xf32>, vector<2x1xf32>, vector<2x1xf32>, vector<2x1xf32> -> vector<16x1xf32>
    %335 = arith.subf %318, %334 : vector<16x1xf32>
    %336 = math.exp %335 : vector<16x1xf32>
    %337 = vector.extract_strided_slice %336 {offsets = [0, 0], sizes = [2, 1], strides = [1, 1]} : vector<16x1xf32> to vector<2x1xf32>
    %338 = vector.extract_strided_slice %336 {offsets = [2, 0], sizes = [2, 1], strides = [1, 1]} : vector<16x1xf32> to vector<2x1xf32>
    %339 = arith.addf %337, %338 : vector<2x1xf32>
    %340 = vector.extract_strided_slice %336 {offsets = [4, 0], sizes = [2, 1], strides = [1, 1]} : vector<16x1xf32> to vector<2x1xf32>
    %341 = arith.addf %339, %340 : vector<2x1xf32>
    %342 = vector.extract_strided_slice %336 {offsets = [6, 0], sizes = [2, 1], strides = [1, 1]} : vector<16x1xf32> to vector<2x1xf32>
    %343 = arith.addf %341, %342 : vector<2x1xf32>
    %344 = vector.extract_strided_slice %336 {offsets = [8, 0], sizes = [2, 1], strides = [1, 1]} : vector<16x1xf32> to vector<2x1xf32>
    %345 = arith.addf %343, %344 : vector<2x1xf32>
    %346 = vector.extract_strided_slice %336 {offsets = [10, 0], sizes = [2, 1], strides = [1, 1]} : vector<16x1xf32> to vector<2x1xf32>
    %347 = arith.addf %345, %346 : vector<2x1xf32>
    %348 = vector.extract_strided_slice %336 {offsets = [12, 0], sizes = [2, 1], strides = [1, 1]} : vector<16x1xf32> to vector<2x1xf32>
    %349 = arith.addf %347, %348 : vector<2x1xf32>
    %350 = vector.extract_strided_slice %336 {offsets = [14, 0], sizes = [2, 1], strides = [1, 1]} : vector<16x1xf32> to vector<2x1xf32>
    %351 = arith.addf %349, %350 : vector<2x1xf32>
    %352 = tpu.concatenate %351, %351, %351, %351, %351, %351, %351, %351 in 0 : vector<2x1xf32>, vector<2x1xf32>, vector<2x1xf32>, vector<2x1xf32>, vector<2x1xf32>, vector<2x1xf32>, vector<2x1xf32>, vector<2x1xf32> -> vector<16x1xf32>
    %353 = arith.divf %336, %352 : vector<16x1xf32>
    %354 = arith.mulf %353, %304 : vector<16x1xf32>
    %355 = vector.broadcast %354 : vector<16x1xf32> to vector<16x64xf32>
    %356 = arith.mulf %303, %355 : vector<16x64xf32>
    %cst_86 = arith.constant 0.000000e+00 : f32
    %357 = vector.broadcast %cst_86 : f32 to vector<2x64xf32>
    %358 = vector.extract_strided_slice %356 {offsets = [0, 0], sizes = [14, 64], strides = [1, 1]} : vector<16x64xf32> to vector<14x64xf32>
    %359 = tpu.concatenate %357, %358 in 0 : vector<2x64xf32>, vector<14x64xf32> -> vector<16x64xf32>
    %360 = vector.extract_strided_slice %356 {offsets = [2, 0], sizes = [14, 64], strides = [1, 1]} : vector<16x64xf32> to vector<14x64xf32>
    %361 = tpu.concatenate %360, %357 in 0 : vector<14x64xf32>, vector<2x64xf32> -> vector<16x64xf32>
    %c64_87 = arith.constant 64 : index
    %c0_88 = arith.constant 0 : index
    %362 = vector.load %arg4[%c64_87, %c0_88] : memref<355x64xf32, #tpu.memory_space<vmem>>, vector<64x32xf32>
    %363 = arith.truncf %359 : vector<16x64xf32> to vector<16x64xbf16>
    %364 = arith.truncf %362 : vector<64x32xf32> to vector<64x32xbf16>
    %cst_89 = arith.constant dense<0.000000e+00> : vector<16x32xf32>
    %365 = tpu.matmul %363, %364, %cst_89 {dimension_numbers = #tpu.dot_dimension_numbers<[1], [0], [0], [1], [0, 0, 1, 1], [], []>} : vector<16x64xbf16>, vector<64x32xbf16>, vector<16x32xf32> -> vector<16x32xf32>
    %c128 = arith.constant 128 : index
    %c0_90 = arith.constant 0 : index
    %366 = vector.load %arg4[%c128, %c0_90] : memref<355x64xf32, #tpu.memory_space<vmem>>, vector<64x32xf32>
    %367 = arith.truncf %356 : vector<16x64xf32> to vector<16x64xbf16>
    %368 = arith.truncf %366 : vector<64x32xf32> to vector<64x32xbf16>
    %cst_91 = arith.constant dense<0.000000e+00> : vector<16x32xf32>
    %369 = tpu.matmul %367, %368, %cst_91 {dimension_numbers = #tpu.dot_dimension_numbers<[1], [0], [0], [1], [0, 0, 1, 1], [], []>} : vector<16x64xbf16>, vector<64x32xbf16>, vector<16x32xf32> -> vector<16x32xf32>
    %370 = arith.addf %365, %369 : vector<16x32xf32>
    %c192 = arith.constant 192 : index
    %c0_92 = arith.constant 0 : index
    %371 = vector.load %arg4[%c192, %c0_92] : memref<355x64xf32, #tpu.memory_space<vmem>>, vector<64x32xf32>
    %372 = arith.truncf %361 : vector<16x64xf32> to vector<16x64xbf16>
    %373 = arith.truncf %371 : vector<64x32xf32> to vector<64x32xbf16>
    %cst_93 = arith.constant dense<0.000000e+00> : vector<16x32xf32>
    %374 = tpu.matmul %372, %373, %cst_93 {dimension_numbers = #tpu.dot_dimension_numbers<[1], [0], [0], [1], [0, 0, 1, 1], [], []>} : vector<16x64xbf16>, vector<64x32xbf16>, vector<16x32xf32> -> vector<16x32xf32>
    %375 = arith.addf %370, %374 : vector<16x32xf32>
    %c353 = arith.constant 353 : index
    %c0_94 = arith.constant 0 : index
    %376 = vector.load %arg4[%c353, %c0_94] : memref<355x64xf32, #tpu.memory_space<vmem>>, vector<1x32xf32>
    %377 = vector.broadcast %376 : vector<1x32xf32> to vector<16x32xf32>
    %378 = arith.addf %375, %377 : vector<16x32xf32>
    %c0_95 = arith.constant 0 : index
    %c1 = arith.constant 1 : index
    %379 = vector.load %arg2[%c0_95, %c1] : memref<16x4xf32, #tpu.memory_space<vmem>>, vector<16x1xf32>
    %cst_96 = arith.constant 0.000000e+00 : f32
    %380 = vector.broadcast %cst_96 : f32 to vector<16x1xf32>
    %381 = arith.cmpf ogt, %379, %380 : vector<16x1xf32>
    %cst_97 = arith.constant -1.000000e+30 : f32
    %382 = vector.shape_cast %381 : vector<16x1xi1> to vector<16x1xi1>
    %383 = vector.broadcast %382 : vector<16x1xi1> to vector<16x32xi1>
    %384 = vector.broadcast %cst_97 : f32 to vector<16x32xf32>
    %385 = arith.select %383, %378, %384 : vector<16x32xi1>, vector<16x32xf32>
    %386 = vector.extract_strided_slice %385 {offsets = [0, 0], sizes = [2, 32], strides = [1, 1]} : vector<16x32xf32> to vector<2x32xf32>
    %387 = vector.extract_strided_slice %385 {offsets = [2, 0], sizes = [2, 32], strides = [1, 1]} : vector<16x32xf32> to vector<2x32xf32>
    %388 = arith.maximumf %386, %387 : vector<2x32xf32>
    %389 = vector.extract_strided_slice %385 {offsets = [4, 0], sizes = [2, 32], strides = [1, 1]} : vector<16x32xf32> to vector<2x32xf32>
    %390 = arith.maximumf %388, %389 : vector<2x32xf32>
    %391 = vector.extract_strided_slice %385 {offsets = [6, 0], sizes = [2, 32], strides = [1, 1]} : vector<16x32xf32> to vector<2x32xf32>
    %392 = arith.maximumf %390, %391 : vector<2x32xf32>
    %393 = vector.extract_strided_slice %385 {offsets = [8, 0], sizes = [2, 32], strides = [1, 1]} : vector<16x32xf32> to vector<2x32xf32>
    %394 = arith.maximumf %392, %393 : vector<2x32xf32>
    %395 = vector.extract_strided_slice %385 {offsets = [10, 0], sizes = [2, 32], strides = [1, 1]} : vector<16x32xf32> to vector<2x32xf32>
    %396 = arith.maximumf %394, %395 : vector<2x32xf32>
    %397 = vector.extract_strided_slice %385 {offsets = [12, 0], sizes = [2, 32], strides = [1, 1]} : vector<16x32xf32> to vector<2x32xf32>
    %398 = arith.maximumf %396, %397 : vector<2x32xf32>
    %399 = vector.extract_strided_slice %385 {offsets = [14, 0], sizes = [2, 32], strides = [1, 1]} : vector<16x32xf32> to vector<2x32xf32>
    %400 = arith.maximumf %398, %399 : vector<2x32xf32>
    %401 = math.tanh %400 : vector<2x32xf32>
    %c0_98 = arith.constant 0 : index
    %c2_99 = arith.constant 2 : index
    %402 = vector.load %arg2[%c0_98, %c2_99] : memref<16x4xf32, #tpu.memory_space<vmem>>, vector<16x1xf32>
    %cst_100 = arith.constant 0.000000e+00 : f32
    %403 = vector.broadcast %cst_100 : f32 to vector<16x1xf32>
    %404 = arith.cmpf ogt, %402, %403 : vector<16x1xf32>
    %cst_101 = arith.constant -1.000000e+30 : f32
    %405 = vector.shape_cast %404 : vector<16x1xi1> to vector<16x1xi1>
    %406 = vector.broadcast %405 : vector<16x1xi1> to vector<16x32xi1>
    %407 = vector.broadcast %cst_101 : f32 to vector<16x32xf32>
    %408 = arith.select %406, %378, %407 : vector<16x32xi1>, vector<16x32xf32>
    %409 = vector.extract_strided_slice %408 {offsets = [0, 0], sizes = [2, 32], strides = [1, 1]} : vector<16x32xf32> to vector<2x32xf32>
    %410 = vector.extract_strided_slice %408 {offsets = [2, 0], sizes = [2, 32], strides = [1, 1]} : vector<16x32xf32> to vector<2x32xf32>
    %411 = arith.maximumf %409, %410 : vector<2x32xf32>
    %412 = vector.extract_strided_slice %408 {offsets = [4, 0], sizes = [2, 32], strides = [1, 1]} : vector<16x32xf32> to vector<2x32xf32>
    %413 = arith.maximumf %411, %412 : vector<2x32xf32>
    %414 = vector.extract_strided_slice %408 {offsets = [6, 0], sizes = [2, 32], strides = [1, 1]} : vector<16x32xf32> to vector<2x32xf32>
    %415 = arith.maximumf %413, %414 : vector<2x32xf32>
    %416 = vector.extract_strided_slice %408 {offsets = [8, 0], sizes = [2, 32], strides = [1, 1]} : vector<16x32xf32> to vector<2x32xf32>
    %417 = arith.maximumf %415, %416 : vector<2x32xf32>
    %418 = vector.extract_strided_slice %408 {offsets = [10, 0], sizes = [2, 32], strides = [1, 1]} : vector<16x32xf32> to vector<2x32xf32>
    %419 = arith.maximumf %417, %418 : vector<2x32xf32>
    %420 = vector.extract_strided_slice %408 {offsets = [12, 0], sizes = [2, 32], strides = [1, 1]} : vector<16x32xf32> to vector<2x32xf32>
    %421 = arith.maximumf %419, %420 : vector<2x32xf32>
    %422 = vector.extract_strided_slice %408 {offsets = [14, 0], sizes = [2, 32], strides = [1, 1]} : vector<16x32xf32> to vector<2x32xf32>
    %423 = arith.maximumf %421, %422 : vector<2x32xf32>
    %424 = math.tanh %423 : vector<2x32xf32>
    %c0_102 = arith.constant 0 : index
    %c3 = arith.constant 3 : index
    %425 = vector.load %arg2[%c0_102, %c3] : memref<16x4xf32, #tpu.memory_space<vmem>>, vector<16x1xf32>
    %cst_103 = arith.constant 0.000000e+00 : f32
    %426 = vector.broadcast %cst_103 : f32 to vector<16x1xf32>
    %427 = arith.cmpf ogt, %425, %426 : vector<16x1xf32>
    %cst_104 = arith.constant -1.000000e+30 : f32
    %428 = vector.shape_cast %427 : vector<16x1xi1> to vector<16x1xi1>
    %429 = vector.broadcast %428 : vector<16x1xi1> to vector<16x32xi1>
    %430 = vector.broadcast %cst_104 : f32 to vector<16x32xf32>
    %431 = arith.select %429, %378, %430 : vector<16x32xi1>, vector<16x32xf32>
    %432 = vector.extract_strided_slice %431 {offsets = [0, 0], sizes = [2, 32], strides = [1, 1]} : vector<16x32xf32> to vector<2x32xf32>
    %433 = vector.extract_strided_slice %431 {offsets = [2, 0], sizes = [2, 32], strides = [1, 1]} : vector<16x32xf32> to vector<2x32xf32>
    %434 = arith.maximumf %432, %433 : vector<2x32xf32>
    %435 = vector.extract_strided_slice %431 {offsets = [4, 0], sizes = [2, 32], strides = [1, 1]} : vector<16x32xf32> to vector<2x32xf32>
    %436 = arith.maximumf %434, %435 : vector<2x32xf32>
    %437 = vector.extract_strided_slice %431 {offsets = [6, 0], sizes = [2, 32], strides = [1, 1]} : vector<16x32xf32> to vector<2x32xf32>
    %438 = arith.maximumf %436, %437 : vector<2x32xf32>
    %439 = vector.extract_strided_slice %431 {offsets = [8, 0], sizes = [2, 32], strides = [1, 1]} : vector<16x32xf32> to vector<2x32xf32>
    %440 = arith.maximumf %438, %439 : vector<2x32xf32>
    %441 = vector.extract_strided_slice %431 {offsets = [10, 0], sizes = [2, 32], strides = [1, 1]} : vector<16x32xf32> to vector<2x32xf32>
    %442 = arith.maximumf %440, %441 : vector<2x32xf32>
    %443 = vector.extract_strided_slice %431 {offsets = [12, 0], sizes = [2, 32], strides = [1, 1]} : vector<16x32xf32> to vector<2x32xf32>
    %444 = arith.maximumf %442, %443 : vector<2x32xf32>
    %445 = vector.extract_strided_slice %431 {offsets = [14, 0], sizes = [2, 32], strides = [1, 1]} : vector<16x32xf32> to vector<2x32xf32>
    %446 = arith.maximumf %444, %445 : vector<2x32xf32>
    %447 = math.tanh %446 : vector<2x32xf32>
    %448 = tpu.concatenate %401, %424, %447 in 1 : vector<2x32xf32>, vector<2x32xf32>, vector<2x32xf32> -> vector<2x96xf32>
    %c256 = arith.constant 256 : index
    %c0_105 = arith.constant 0 : index
    %449 = vector.load %arg4[%c256, %c0_105] : memref<355x64xf32, #tpu.memory_space<vmem>>, vector<96x5xf32>
    %450 = arith.truncf %448 : vector<2x96xf32> to vector<2x96xbf16>
    %451 = arith.truncf %449 : vector<96x5xf32> to vector<96x5xbf16>
    %cst_106 = arith.constant dense<0.000000e+00> : vector<2x5xf32>
    %452 = tpu.matmul %450, %451, %cst_106 {dimension_numbers = #tpu.dot_dimension_numbers<[1], [0], [0], [1], [0, 0, 1, 1], [], []>} : vector<2x96xbf16>, vector<96x5xbf16>, vector<2x5xf32> -> vector<2x5xf32>
    %c354 = arith.constant 354 : index
    %c0_107 = arith.constant 0 : index
    %453 = vector.load %arg4[%c354, %c0_107] : memref<355x64xf32, #tpu.memory_space<vmem>>, vector<1x5xf32>
    %454 = vector.broadcast %453 : vector<1x5xf32> to vector<2x5xf32>
    %455 = arith.addf %452, %454 : vector<2x5xf32>
    %c0_108 = arith.constant 0 : index
    %c0_109 = arith.constant 0 : index
    %456 = vector.load %arg5[%c0_108, %c0_109] : memref<2x5xf32, #tpu.memory_space<vmem>>, vector<2x5xf32>
    tpu.vector_store %arg5[%c0_108, %c0_109], %455 {strides = array<i32>} : memref<2x5xf32, #tpu.memory_space<vmem>>, vector<2x5xf32>,
    return
  }
  func.func @transform_0(%arg0: i32) -> (i32, i32) {
    %c0_i32 = arith.constant 0 : i32
    %c0_i32_0 = arith.constant 0 : i32
    %c0_i32_1 = arith.constant 0 : i32
    return %c0_i32, %c0_i32_0 : i32, i32
  }
  func.func @transform_1(%arg0: i32) -> (i32, i32) {
    %c0_i32 = arith.constant 0 : i32
    %c0_i32_0 = arith.constant 0 : i32
    %c0_i32_1 = arith.constant 0 : i32
    return %c0_i32, %c0_i32_0 : i32, i32
  }
  func.func @transform_2(%arg0: i32) -> (i32, i32) {
    %c0_i32 = arith.constant 0 : i32
    %c0_i32_0 = arith.constant 0 : i32
    %c0_i32_1 = arith.constant 0 : i32
    return %c0_i32, %c0_i32_0 : i32, i32
  }
  func.func @transform_3(%arg0: i32) -> (i32, i32) {
    %c0_i32 = arith.constant 0 : i32
    %c0_i32_0 = arith.constant 0 : i32
    %c0_i32_1 = arith.constant 0 : i32
    return %c0_i32, %c0_i32_0 : i32, i32
  }
  func.func @transform_4(%arg0: i32) -> (i32, i32) {
    %c0_i32 = arith.constant 0 : i32
    %c0_i32_0 = arith.constant 0 : i32
    %c0_i32_1 = arith.constant 0 : i32
    return %c0_i32, %c0_i32_0 : i32, i32
  }
}

</mosaic_0001>

<bundles_post_ra>
// kernel: bgwa_pallas.1
= control target key start
LH: loop header
LB: loop body
LE: loop exit
PB: predicated region body
PF: predicated region fallthrough
CT: control target
= control target key end

     0   :  { %v1555_v7 = vmov 0   ;;  %vm43_vm0 = vcmask 1041408   ;;  %s2112_s0 = inlined_call_operand.vmem [shape: f32[16,32], index: 0, kind: input, shape index: {}]   ;;  %s2113_s1 = inlined_call_operand.vmem [shape: f32[16,4], index: 1, kind: input, shape index: {}]   ;;  %s2114_s2 = inlined_call_operand.vmem [shape: f32[67,256], index: 2, kind: input, shape index: {}]   ;;  %s2115_s3 = inlined_call_operand.vmem [shape: f32[355,64], index: 3, kind: input, shape index: {}]   ;;  %s2116_s4 = inlined_call_operand.hbm [shape: f32[2,5], index: 4, kind: output, shape index: {}]  }
   0x1   :  { %v32_v0 = vld [vmem:[%s2114_s2 + $0x48] sm:$0xff]  ;;  %v34_v1 = vld [vmem:[%s2114_s2 + $0x58] sm:$0xff]  ;;  %v31_v2 = vld [vmem:[%s2114_s2 + $0x40] sm:$0xff]  ;;  %99 = vmatprep.mubr.bf16.mxu0 %v1555_v7  ;;  %350 = vmatprep.mubr.bf16.mxu1 %v1555_v7 }
   0x2   :  { %v49_v3 = vpack.c.bf16 %v34_v1, %v32_v0  ;;  %v33_v4 = vld [vmem:[%s2114_s2 + $0x50] sm:$0xff]  ;;  %v36_v5 = vld [vmem:[%s2114_s2 + $0x68] sm:$0xff]  ;;  %v38_v6 = vld [vmem:[%s2114_s2 + $0x78] sm:$0xff]  ;;  %1476 = vset.pattern.permute.xlu1 %v1555_v7  ;;  %1475 = vset.pattern.permute.xlu0 %v1555_v7 }
   0x3   :  { %v48_v8 = vpack.c.bf16 %v33_v4, %v31_v2  ;;  %v51_v9 = vpack.c.bf16 %v38_v6, %v36_v5  ;;  %v35_v10 = vld [vmem:[%s2114_s2 + $0x60] sm:$0xff]  ;;  %v37_v11 = vld [vmem:[%s2114_s2 + $0x70] sm:$0xff]  ;;  %v46_v13 = vld [vmem:[%s2112_s0 + $0x8] sm:$0xff] }
   0x4   :  { %v45_v12 = vld [vmem:[%s2112_s0] sm:$0xff]  ;;  %67 = vmatprep.subr.bf16.mxu0 %v49_v3  ;;  %v20_v14 = vld [vmem:[%s2114_s2 + $0x8] sm:$0xff]  ;;  %v22_v15 = vld [vmem:[%s2114_s2 + $0x18] sm:$0xff]  ;;  %v50_v16 = vpack.c.bf16 %v37_v11, %v35_v10 }
   0x5   :  { %68 = vmatpush1.bf16.msra.mxu0 %v48_v8  ;;  %v1630_v17 = vpack.c.bf16 %v22_v15, %v20_v14  ;;  %v19_v18 = vld [vmem:[%s2114_s2] sm:$0xff]  ;;  %v21_v19 = vld [vmem:[%s2114_s2 + $0x10] sm:$0xff]  ;;  %v24_v20 = vld [vmem:[%s2114_s2 + $0x28] sm:$0xff] }
   0x6   :  { %69 = vmatprep.subr.bf16.mxu0 %v51_v9  ;;  %v1641_v21 = vpack.c.bf16 %v21_v19, %v19_v18  ;;  %v26_v22 = vld [vmem:[%s2114_s2 + $0x38] sm:$0xff]  ;;  %v23_v23 = vld [vmem:[%s2114_s2 + $0x20] sm:$0xff]  ;;  %v25_v24 = vld [vmem:[%s2114_s2 + $0x30] sm:$0xff] }
   0x7   :  { %v41_v25 = vld [vmem:[%s2114_s2 + $0x81] ss:$0 sm:$0xff]  ;;  %v42_v26 = vld [vmem:[%s2114_s2 + $0x82] ss:$0 sm:$0xff]  ;;  %318 = vmatprep.subr.bf16.mxu1 %v1630_v17 }
   0x8   :  { %9 = vsyncpa [#allocation5], 0  ;;  %v47_v27 = vpack.c.bf16 %v46_v13, %v45_v12  ;;  %v1659_v28 = vpack.c.bf16 %v26_v22, %v24_v20  ;;  %v44_v29 = vsel %vm43_vm0, %v41_v25, %v42_v26  ;;  %319 = vmatpush1.bf16.msra.mxu1 %v1641_v21  ;;  %vm63_vm1 = vcmask 261120   ;;  %s1556_s28 = smov 64   ;;  %s1559_s0 = smov 32  }
   0x9   :  { %70 = vmatpush1.bf16.msra.mxu0 %v50_v16  ;;  %200 = vrot.lane.b32.xlu0 %v44_v29, %s1556_s28  ;;  %v1665_v30 = vpack.c.bf16 %v25_v24, %v23_v23  ;;  %v53_v31 = vlaneseq  ;;  %v1357_v34 = vld [vmem:[%s2114_s2 + $0x80] ss:$8 sm:$0x3]  ;;  %s1557_s2 = smov 96   ;;  %vm227_vm3 = vcmask 254976   ;;  %vm229_vm4 = vcmask 257026  }
   0xa   :  { %152 = vmatprep.subr.bf16.mxu0 %v1630_v17  ;;  %320 = vmatprep.subr.bf16.mxu1 %v1659_v28  ;;  %vm1560_vm5 = vmmov 0   ;;  %vm820_vm6 = vcmask 523264   ;;  %vm913_vm9 = vcmask 1043456   ;;  %vm915_vm10 = vcmask 1045504   ;;  %s1564_s22 = smov [#allocation4]  }
   0xb   :  { %v1682_v32 = vshrl.u32 %v53_v31, 7  ;;  %s1349_s23 = sshll.u32 %s1564_s22, 4  ;;  %s1350_s23 = int_to_ptr.vmem [resolvable:$true] %s1349_s23 }
   0xc   :  { %1358 = vmatmul.mubr.msk.bf16.vlgmr.msra.gmra.mrb[0].mxu0 %vm63_vm1, %v47_v27  ;;  %321 = vmatpush1.bf16.msra.mxu1 %v1665_v30  ;;  %p1536_p1 = scmp.lt.s32.totalorder %s1350_s23, %s1350_s23 }
   0xd   :  { %153 = vmatpush1.bf16.msra.mxu0 %v1641_v21  ;;  %184 = vmatprep.mubr.bf16.mxu0 %v1555_v7  ;;  %v55_v33 = vsub.s32 0, %v1682_v32  ;;  %v59_v35 = vsub.s32 1, %v1682_v32  ;;  %vm148_vm2 = vcmp.lt.s32.totalorder %v1682_v32, 2 }
   0xe   :  { %154 = vmatprep.subr.bf16.mxu0 %v1659_v28  ;;  %478 = vmatprep.subr.bf16.mxu1 %v1630_v17 }
   0xf   :  { %v56_v36 = vrot.slane %v1357_v34, %v55_v33  ;;  %v60_v37 = vrot.slane %v1357_v34, %v59_v35 }
  0x11   :  { %155 = vmatpush1.bf16.msra.mxu0 %v1665_v30 }
  0x12   :  { %238 = vmatprep.subr.bf16.mxu0 %v1630_v17 }
  0x14   :  { %185 = vmatmul.mubr.bf16.vlgmr.msra.gmra.mrb[4].mxu0 %v1555_v7 }
  0x15   :  { %239 = vmatpush1.bf16.msra.mxu0 %v1641_v21  ;;  %270 = vmatprep.mubr.bf16.mxu0 %v1555_v7 }
  0x16   :  { %240 = vmatprep.subr.bf16.mxu0 %v1659_v28 }
  0x19   :  { %241 = vmatpush1.bf16.msra.mxu0 %v1665_v30 }
  0x1a   :  { %398 = vmatprep.subr.bf16.mxu0 %v1630_v17 }
  0x7b   :  { %v1706_v1 = vpop.permute.xlu0 %200 }
  0xdf   :  { %v101_v38 = vpop.f32.mrb[0].mxu0 }
  0xe0   :  { %v102_v39 = vadd.f32 %v101_v38, %v56_v36  ;;  %v103_v40 = vpop.f32.mrb[1].mxu0 }
  0xe1   :  { %v104_v41 = vadd.f32 %v103_v40, %v60_v37  ;;  %v105_v42 = vpop.f32.mrb[2].mxu0 }
  0xe2   :  { %v106_v43 = vadd.f32 %v105_v42, %v56_v36  ;;  %v107_v44 = vpop.f32.mrb[3].mxu0  ;;  %v115_v45 = vrot.slane %v102_v39, 2  ;;  %v120_v46 = vrot.slane %v102_v39, 4  ;;  %v123_v51 = vrot.slane %v102_v39, 6 }
  0xe3   :  { %v108_v47 = vadd.f32 %v107_v44, %v60_v37  ;;  %v129_v48 = vrot.slane %v104_v41, 4  ;;  %v135_v49 = vrot.slane %v104_v41, 2  ;;  %v143_v50 = vrot.slane %v104_v41, 6 }
  0xe4   :  { %v133_v52 = vrot.slane %v106_v43, 2  ;;  %v138_v53 = vrot.slane %v106_v43, 4  ;;  %v141_v54 = vrot.slane %v106_v43, 6 }
  0xe5   :  { %v111_v55 = vrot.slane %v108_v47, 4  ;;  %v117_v56 = vrot.slane %v108_v47, 2  ;;  %v1691_v57 = vsel %vm43_vm0, %v120_v46, %v108_v47  ;;  %v125_v58 = vrot.slane %v108_v47, 6 }
  0xe6   :  { %v1694_v59 = vsel %vm43_vm0, %v106_v43, %v129_v48  ;;  %v1697_v60 = vsel %vm43_vm0, %v133_v52, %v135_v49  ;;  %v1700_v61 = vsel %vm43_vm0, %v138_v53, %v104_v41  ;;  %v1703_v62 = vsel %vm43_vm0, %v141_v54, %v143_v50 }
  0xe7   :  { %v186_v63 = vpop.f32.mrb[4].mxu0  ;;  %v113_v0 = vsel %vm43_vm0, %v102_v39, %v111_v55  ;;  %v119_v2 = vsel %vm43_vm0, %v115_v45, %v117_v56  ;;  %v1710_v3 = vsel %vm43_vm0, %v123_v51, %v125_v58 }
  0xe8   :  { %v188_v4 = vpop.f32.mrb[5].mxu0 }
  0xe9   :  { %v193_v5 = vsel %vm148_vm2, %v186_v63, %v188_v4  ;;  %v190_v6 = vpop.f32.mrb[6].mxu0 }
  0xea   :  { %v191_v8 = vpop.f32.mrb[7].mxu0  ;;  %v203_v9 = vadd.f32 %v1706_v1, %v193_v5  ;;  %v194_v10 = vadd.f32 %v193_v5, %v113_v0 }
  0xec   :  { %205 = vrot.lane.b32.xlu0 %v203_v9, %s1556_s28  ;;  %v195_v11 = vmul.f32 0.5, %v194_v10 }
  0xee   :  { %1483 = vtanh.f32 %v195_v11 }
  0xf8   :  { %v1484_v12 = vpop.eup %1483 }
  0xf9   :  { %v197_v13 = vadd.f32 1.0, %v1484_v12 }
  0xfb   :  { %v198_v14 = vmul.f32 0.5, %v197_v13 }
  0xfd   :  { %v215_v22 = vsub.f32 1.0, %v198_v14  ;;  %v221_v24 = vmul.f32 0.0, %v198_v14 }
 0x15e   :  { %v206_v15 = vpop.permute.xlu0 %205 }
 0x15f   :  { %v208_v16 = vmul.f32 %v206_v15, %v198_v14 }
 0x161   :  { %210 = vrot.lane.b32.xlu1 %v208_v16, %s1556_s28 }
 0x1d3   :  { %v211_v18 = vpop.permute.xlu1 %210 }
 0x1d4   :  { %v213_v19 = vadd.f32 %v211_v18, %v113_v0 }
 0x1d6   :  { %1485 = vtanh.f32 %v213_v19 }
 0x1e0   :  { %v1486_v20 = vpop.eup %1485 }
 0x1e1   :  { %217 = vrot.lane.b32.xlu1 %v1486_v20, %s1557_s2 }
 0x253   :  { %v218_v23 = vpop.permute.xlu1 %217 }
 0x254   :  { %v220_v25 = vmul.f32 %v218_v23, %v215_v22 }
 0x256   :  { %v1718_v26 = vadd.f32 %v221_v24, %v220_v25 }
 0x258   :  { %v231_v27 = vpack.c.bf16 %v1718_v26, %v1718_v26 }
 0x25a   :  { %233 = vrot.lane.b32.xlu0 %v231_v27, %s1557_s2 }
 0x2cc   :  { %v234_v29 = vpop.permute.xlu0 %233 }
 0x2cd   :  { %1359 = vmatmul.mubr.msk.bf16.vlgmr.msra.gmra.mrb[8].mxu0 %vm63_vm1, %v234_v29 }
 0x2ce   :  { %399 = vmatpush1.bf16.msra.mxu0 %v1641_v21  ;;  %430 = vmatprep.mubr.bf16.mxu0 %v1555_v7 }
 0x2cf   :  { %400 = vmatprep.subr.bf16.mxu0 %v1659_v28 }
 0x2d2   :  { %401 = vmatpush1.bf16.msra.mxu0 %v1665_v30 }
 0x2d3   :  { %558 = vmatprep.subr.bf16.mxu0 %v1630_v17 }
 0x3a0   :  { %v272_v31 = vpop.f32.mrb[8].mxu0 }
 0x3a1   :  { %v274_v33 = vpop.f32.mrb[9].mxu0 }
 0x3a2   :  { %v279_v34 = vsel %vm148_vm2, %v272_v31, %v274_v33  ;;  %v276_v35 = vpop.f32.mrb[10].mxu0 }
 0x3a3   :  { %v285_v36 = vadd.f32 %v279_v34, %v1706_v1  ;;  %v277_v37 = vpop.f32.mrb[11].mxu0  ;;  %v280_v38 = vadd.f32 %v279_v34, %v119_v2 }
 0x3a5   :  { %287 = vrot.lane.b32.xlu1 %v285_v36, %s1556_s28  ;;  %v281_v39 = vmul.f32 0.5, %v280_v38 }
 0x3a7   :  { %1487 = vtanh.f32 %v281_v39 }
 0x3b1   :  { %v1488_v40 = vpop.eup %1487 }
 0x3b2   :  { %v283_v41 = vadd.f32 1.0, %v1488_v40 }
 0x3b4   :  { %v284_v42 = vmul.f32 0.5, %v283_v41 }
 0x3b6   :  { %v297_v48 = vsub.f32 1.0, %v284_v42  ;;  %v303_v50 = vmul.f32 %v284_v42, %v1718_v26 }
 0x417   :  { %v288_v43 = vpop.permute.xlu1 %287 }
 0x418   :  { %v290_v44 = vmul.f32 %v288_v43, %v284_v42 }
 0x41a   :  { %292 = vrot.lane.b32.xlu0 %v290_v44, %s1556_s28 }
 0x48c   :  { %v293_v45 = vpop.permute.xlu0 %292 }
 0x48d   :  { %v295_v46 = vadd.f32 %v293_v45, %v119_v2 }
 0x48f   :  { %1489 = vtanh.f32 %v295_v46 }
 0x499   :  { %v1490_v47 = vpop.eup %1489 }
 0x49a   :  { %299 = vrot.lane.b32.xlu1 %v1490_v47, %s1557_s2 }
 0x50c   :  { %v300_v49 = vpop.permute.xlu1 %299 }
 0x50d   :  { %v302_v51 = vmul.f32 %v300_v49, %v297_v48 }
 0x50f   :  { %v1736_v52 = vadd.f32 %v303_v50, %v302_v51 }
 0x511   :  { %v311_v53 = vpack.c.bf16 %v1736_v52, %v1736_v52 }
 0x513   :  { %313 = vrot.lane.b32.xlu0 %v311_v53, %s1557_s2 }
 0x585   :  { %v314_v54 = vpop.permute.xlu0 %313 }
 0x586   :  { %1360 = vmatmul.mubr.msk.bf16.vlgmr.msra.gmra.mrb[0].mxu1 %vm63_vm1, %v314_v54 }
 0x587   :  { %479 = vmatpush1.bf16.msra.mxu1 %v1641_v21  ;;  %510 = vmatprep.mubr.bf16.mxu1 %v1555_v7 }
 0x588   :  { %480 = vmatprep.subr.bf16.mxu1 %v1659_v28 }
 0x58b   :  { %481 = vmatpush1.bf16.msra.mxu1 %v1665_v30 }
 0x58c   :  { %638 = vmatprep.subr.bf16.mxu1 %v1630_v17 }
 0x659   :  { %v352_v55 = vpop.f32.mrb[0].mxu1 }
 0x65a   :  { %v354_v56 = vpop.f32.mrb[1].mxu1 }
 0x65b   :  { %v359_v58 = vsel %vm148_vm2, %v352_v55, %v354_v56  ;;  %v356_v63 = vpop.f32.mrb[2].mxu1 }
 0x65c   :  { %v365_v0 = vadd.f32 %v359_v58, %v1706_v1  ;;  %v357_v2 = vpop.f32.mrb[3].mxu1  ;;  %v360_v4 = vadd.f32 %v359_v58, %v1691_v57 }
 0x65e   :  { %367 = vrot.lane.b32.xlu1 %v365_v0, %s1556_s28  ;;  %v361_v5 = vmul.f32 0.5, %v360_v4 }
 0x660   :  { %1491 = vtanh.f32 %v361_v5 }
 0x66a   :  { %v1492_v6 = vpop.eup %1491 }
 0x66b   :  { %v363_v8 = vadd.f32 1.0, %v1492_v6 }
 0x66d   :  { %v364_v9 = vmul.f32 0.5, %v363_v8 }
 0x66f   :  { %v377_v15 = vsub.f32 1.0, %v364_v9  ;;  %v383_v18 = vmul.f32 %v364_v9, %v1736_v52 }
 0x6d0   :  { %v368_v10 = vpop.permute.xlu1 %367 }
 0x6d1   :  { %v370_v11 = vmul.f32 %v368_v10, %v364_v9 }
 0x6d3   :  { %372 = vrot.lane.b32.xlu0 %v370_v11, %s1556_s28 }
 0x745   :  { %v373_v12 = vpop.permute.xlu0 %372 }
 0x746   :  { %v375_v13 = vadd.f32 %v373_v12, %v1691_v57 }
 0x748   :  { %1493 = vtanh.f32 %v375_v13 }
 0x752   :  { %v1494_v14 = vpop.eup %1493 }
 0x753   :  { %379 = vrot.lane.b32.xlu1 %v1494_v14, %s1557_s2 }
 0x7c5   :  { %v380_v16 = vpop.permute.xlu1 %379 }
 0x7c6   :  { %v382_v19 = vmul.f32 %v380_v16, %v377_v15 }
 0x7c8   :  { %v1756_v20 = vadd.f32 %v383_v18, %v382_v19 }
 0x7ca   :  { %v391_v22 = vpack.c.bf16 %v1756_v20, %v1756_v20 }
 0x7cc   :  { %393 = vrot.lane.b32.xlu0 %v391_v22, %s1557_s2 }
 0x83e   :  { %v394_v23 = vpop.permute.xlu0 %393 }
 0x83f   :  { %1361 = vmatmul.mubr.msk.bf16.vlgmr.msra.gmra.mrb[12].mxu0 %vm63_vm1, %v394_v23 }
 0x840   :  { %559 = vmatpush1.bf16.msra.mxu0 %v1641_v21  ;;  %590 = vmatprep.mubr.bf16.mxu0 %v1555_v7 }
 0x841   :  { %560 = vmatprep.subr.bf16.mxu0 %v1659_v28 }
 0x844   :  { %561 = vmatpush1.bf16.msra.mxu0 %v1665_v30 }
 0x845   :  { %718 = vmatprep.subr.bf16.mxu0 %v1630_v17 }
 0x912   :  { %v432_v57 = vpop.f32.mrb[12].mxu0 }
 0x913   :  { %v434_v24 = vpop.f32.mrb[13].mxu0 }
 0x914   :  { %v439_v25 = vsel %vm148_vm2, %v432_v57, %v434_v24  ;;  %v436_v27 = vpop.f32.mrb[14].mxu0 }
 0x915   :  { %v445_v29 = vadd.f32 %v439_v25, %v1706_v1  ;;  %v437_v31 = vpop.f32.mrb[15].mxu0  ;;  %v440_v33 = vadd.f32 %v439_v25, %v1710_v3 }
 0x917   :  { %447 = vrot.lane.b32.xlu1 %v445_v29, %s1556_s28  ;;  %v441_v34 = vmul.f32 0.5, %v440_v33 }
 0x919   :  { %1495 = vtanh.f32 %v441_v34 }
 0x923   :  { %v1496_v35 = vpop.eup %1495 }
 0x924   :  { %v443_v36 = vadd.f32 1.0, %v1496_v35 }
 0x926   :  { %v444_v37 = vmul.f32 0.5, %v443_v36 }
 0x928   :  { %v457_v42 = vsub.f32 1.0, %v444_v37  ;;  %v463_v44 = vmul.f32 %v444_v37, %v1756_v20 }
 0x989   :  { %v448_v38 = vpop.permute.xlu1 %447 }
 0x98a   :  { %v450_v17 = vmul.f32 %v448_v38, %v444_v37 }
 0x98c   :  { %452 = vrot.lane.b32.xlu0 %v450_v17, %s1556_s28 }
 0x9fe   :  { %v453_v39 = vpop.permute.xlu0 %452 }
 0x9ff   :  { %v455_v40 = vadd.f32 %v453_v39, %v1710_v3 }
 0xa01   :  { %1497 = vtanh.f32 %v455_v40 }
 0xa0b   :  { %v1498_v41 = vpop.eup %1497 }
 0xa0c   :  { %459 = vrot.lane.b32.xlu1 %v1498_v41, %s1557_s2 }
 0xa7e   :  { %v460_v43 = vpop.permute.xlu1 %459 }
 0xa7f   :  { %v462_v45 = vmul.f32 %v460_v43, %v457_v42 }
 0xa81   :  { %v1776_v46 = vadd.f32 %v463_v44, %v462_v45 }
 0xa83   :  { %v471_v47 = vpack.c.bf16 %v1776_v46, %v1776_v46 }
 0xa85   :  { %473 = vrot.lane.b32.xlu0 %v471_v47, %s1557_s2 }
 0xaf7   :  { %v474_v48 = vpop.permute.xlu0 %473 }
 0xaf8   :  { %1362 = vmatmul.mubr.msk.bf16.vlgmr.msra.gmra.mrb[4].mxu1 %vm63_vm1, %v474_v48 }
 0xaf9   :  { %639 = vmatpush1.bf16.msra.mxu1 %v1641_v21  ;;  %670 = vmatprep.mubr.bf16.mxu1 %v1555_v7 }
 0xafa   :  { %640 = vmatprep.subr.bf16.mxu1 %v1659_v28 }
 0xafd   :  { %641 = vmatpush1.bf16.msra.mxu1 %v1665_v30 }
 0xbcb   :  { %v512_v3 = vpop.f32.mrb[4].mxu1 }
 0xbcc   :  { %v514_v49 = vpop.f32.mrb[5].mxu1 }
 0xbcd   :  { %v519_v50 = vsel %vm148_vm2, %v512_v3, %v514_v49  ;;  %v516_v51 = vpop.f32.mrb[6].mxu1 }
 0xbce   :  { %v525_v53 = vadd.f32 %v519_v50, %v1706_v1  ;;  %v517_v54 = vpop.f32.mrb[7].mxu1  ;;  %v520_v55 = vadd.f32 %v519_v50, %v1694_v59 }
 0xbd0   :  { %527 = vrot.lane.b32.xlu1 %v525_v53, %s1556_s28  ;;  %v521_v56 = vmul.f32 0.5, %v520_v55 }
 0xbd2   :  { %1499 = vtanh.f32 %v521_v56 }
 0xbdc   :  { %v1500_v58 = vpop.eup %1499 }
 0xbdd   :  { %v523_v63 = vadd.f32 1.0, %v1500_v58 }
 0xbdf   :  { %v524_v0 = vmul.f32 0.5, %v523_v63 }
 0xbe1   :  { %v537_v9 = vsub.f32 1.0, %v524_v0  ;;  %v543_v11 = vmul.f32 %v524_v0, %v1776_v46 }
 0xc42   :  { %v528_v2 = vpop.permute.xlu1 %527 }
 0xc43   :  { %v530_v4 = vmul.f32 %v528_v2, %v524_v0 }
 0xc45   :  { %532 = vrot.lane.b32.xlu0 %v530_v4, %s1556_s28 }
 0xcb7   :  { %v533_v5 = vpop.permute.xlu0 %532 }
 0xcb8   :  { %v535_v6 = vadd.f32 %v533_v5, %v1694_v59 }
 0xcba   :  { %1501 = vtanh.f32 %v535_v6 }
 0xcc4   :  { %v1502_v8 = vpop.eup %1501 }
 0xcc5   :  { %539 = vrot.lane.b32.xlu1 %v1502_v8, %s1557_s2 }
 0xd37   :  { %v540_v10 = vpop.permute.xlu1 %539 }
 0xd38   :  { %v542_v12 = vmul.f32 %v540_v10, %v537_v9 }
 0xd3a   :  { %v1795_v13 = vadd.f32 %v543_v11, %v542_v12 }
 0xd3c   :  { %v551_v14 = vpack.c.bf16 %v1795_v13, %v1795_v13 }
 0xd3e   :  { %553 = vrot.lane.b32.xlu0 %v551_v14, %s1557_s2 }
 0xdb0   :  { %v554_v15 = vpop.permute.xlu0 %553 }
 0xdb1   :  { %1363 = vmatmul.mubr.msk.bf16.vlgmr.msra.gmra.mrb[16].mxu0 %vm63_vm1, %v554_v15 }
 0xdb2   :  { %719 = vmatpush1.bf16.msra.mxu0 %v1641_v21  ;;  %750 = vmatprep.mubr.bf16.mxu0 %v1555_v7 }
 0xdb3   :  { %720 = vmatprep.subr.bf16.mxu0 %v1659_v28 }
 0xdb6   :  { %721 = vmatpush1.bf16.msra.mxu0 %v1665_v30 }
 0xe84   :  { %v592_v59 = vpop.f32.mrb[16].mxu0 }
 0xe85   :  { %v594_v16 = vpop.f32.mrb[17].mxu0 }
 0xe86   :  { %v599_v18 = vsel %vm148_vm2, %v592_v59, %v594_v16  ;;  %v596_v19 = vpop.f32.mrb[18].mxu0 }
 0xe87   :  { %v605_v22 = vadd.f32 %v599_v18, %v1706_v1  ;;  %v597_v23 = vpop.f32.mrb[19].mxu0  ;;  %v600_v57 = vadd.f32 %v599_v18, %v1697_v60 }
 0xe89   :  { %607 = vrot.lane.b32.xlu1 %v605_v22, %s1556_s28  ;;  %v601_v21 = vmul.f32 0.5, %v600_v57 }
 0xe8b   :  { %1503 = vtanh.f32 %v601_v21 }
 0xe95   :  { %v1504_v24 = vpop.eup %1503 }
 0xe96   :  { %v603_v25 = vadd.f32 1.0, %v1504_v24 }
 0xe98   :  { %v604_v28 = vmul.f32 0.5, %v603_v25 }
 0xe9a   :  { %v617_v34 = vsub.f32 1.0, %v604_v28  ;;  %v623_v36 = vmul.f32 %v604_v28, %v1795_v13 }
 0xefb   :  { %v608_v27 = vpop.permute.xlu1 %607 }
 0xefc   :  { %v610_v30 = vmul.f32 %v608_v27, %v604_v28  ;;  %v807_v27 = vld [vmem:[%s2115_s3] sm:$0xff] }
 0xefe   :  { %612 = vrot.lane.b32.xlu0 %v610_v30, %s1556_s28  ;;  %v1558_v30 = vmov 0.0  }
 0xeff   :  { %1401 = vmatprep.subr.bf16.mxu1 %v1558_v30  ;;  %1413 = vmatprep.subr.bf16.mxu0 %v1558_v30 }
 0xf70   :  { %v613_v29 = vpop.permute.xlu0 %612 }
 0xf71   :  { %v615_v31 = vadd.f32 %v613_v29, %v1697_v60 }
 0xf73   :  { %1505 = vtanh.f32 %v615_v31  ;;  %v810_v31 = vld [vmem:[%s2115_s3 + $0x18] sm:$0xff] }
 0xf7d   :  { %v1506_v33 = vpop.eup %1505 }
 0xf7e   :  { %619 = vrot.lane.b32.xlu1 %v1506_v33, %s1557_s2 }
 0xff0   :  { %v620_v35 = vpop.permute.xlu1 %619 }
 0xff1   :  { %v622_v37 = vmul.f32 %v620_v35, %v617_v34  ;;  %v811_v35 = vld [vmem:[%s2115_s3 + $0x20] sm:$0xff] }
 0xff3   :  { %v1814_v38 = vadd.f32 %v623_v36, %v622_v37  ;;  %v812_v36 = vld [vmem:[%s2115_s3 + $0x28] sm:$0xff] }
 0xff4   :  { %v818_v37 = vpack.c.bf16 %v812_v36, %v811_v35 }
 0xff5   :  { %v631_v17 = vpack.c.bf16 %v1814_v38, %v1814_v38 }
 0xff7   :  { %633 = vrot.lane.b32.xlu0 %v631_v17, %s1557_s2 }
0x1069   :  { %v634_v39 = vpop.permute.xlu0 %633 }
0x106a   :  { %1364 = vmatmul.mubr.msk.bf16.vlgmr.msra.gmra.mrb[8].mxu1 %vm63_vm1, %v634_v39  ;;  %v813_v39 = vld [vmem:[%s2115_s3 + $0x30] sm:$0xff] }
0x106b   :  { %1409 = vmatprep.mubr.msk.bf16.mxu1 %vm1560_vm5, %v1558_v30 }
0x113d   :  { %v672_v60 = vpop.f32.mrb[8].mxu1 }
0x113e   :  { %v674_v40 = vpop.f32.mrb[9].mxu1 }
0x113f   :  { %v679_v41 = vsel %vm148_vm2, %v672_v60, %v674_v40  ;;  %v676_v42 = vpop.f32.mrb[10].mxu1  ;;  %v814_v60 = vld [vmem:[%s2115_s3 + $0x38] sm:$0xff] }
0x1140   :  { %v685_v43 = vadd.f32 %v679_v41, %v1706_v1  ;;  %v677_v44 = vpop.f32.mrb[11].mxu1  ;;  %v680_v45 = vadd.f32 %v679_v41, %v1700_v61  ;;  %v819_v40 = vpack.c.bf16 %v814_v60, %v813_v39 }
0x1142   :  { %687 = vrot.lane.b32.xlu1 %v685_v43, %s1556_s28  ;;  %v681_v47 = vmul.f32 0.5, %v680_v45 }
0x1144   :  { %1507 = vtanh.f32 %v681_v47 }
0x114e   :  { %v1508_v48 = vpop.eup %1507 }
0x114f   :  { %v683_v3 = vadd.f32 1.0, %v1508_v48 }
0x1151   :  { %v684_v49 = vmul.f32 0.5, %v683_v3 }
0x1153   :  { %v697_v56 = vsub.f32 1.0, %v684_v49  ;;  %v703_v63 = vmul.f32 %v684_v49, %v1814_v38 }
0x11b4   :  { %v688_v50 = vpop.permute.xlu1 %687 }
0x11b5   :  { %v690_v51 = vmul.f32 %v688_v50, %v684_v49 }
0x11b7   :  { %692 = vrot.lane.b32.xlu0 %v690_v51, %s1556_s28 }
0x1229   :  { %v693_v53 = vpop.permute.xlu0 %692 }
0x122a   :  { %v695_v54 = vadd.f32 %v693_v53, %v1700_v61 }
0x122c   :  { %1509 = vtanh.f32 %v695_v54 }
0x1236   :  { %v1510_v55 = vpop.eup %1509 }
0x1237   :  { %699 = vrot.lane.b32.xlu1 %v1510_v55, %s1557_s2  ;;  %v1367_v55 = vld [vmem:[%s2115_s3 + $0x160] ss:$0 sm:$0xff] }
0x12a9   :  { %v700_v58 = vpop.permute.xlu1 %699 }
0x12aa   :  { %v702_v0 = vmul.f32 %v700_v58, %v697_v56 }
0x12ac   :  { %v704_v2 = vadd.f32 %v703_v63, %v702_v0 }
0x12ae   :  { %v711_v4 = vpack.c.bf16 %v704_v2, %v704_v2 }
0x12b0   :  { %713 = vrot.lane.b32.xlu0 %v711_v4, %s1557_s2 }
0x1322   :  { %v714_v5 = vpop.permute.xlu0 %713 }
0x1323   :  { %1365 = vmatmul.mubr.msk.bf16.vlgmr.msra.gmra.mrb[20].mxu0 %vm63_vm1, %v714_v5  ;;  %v998_v5 = vld [vmem:[%s2115_s3 + $0x80] sm:$0xff] }
0x1324   :  { %1421 = vmatprep.mubr.msk.bf16.mxu0 %vm1560_vm5, %v1558_v30 }
0x13f6   :  { %v752_v6 = vpop.f32.mrb[20].mxu0 }
0x13f7   :  { %v754_v8 = vpop.f32.mrb[21].mxu0 }
0x13f8   :  { %v759_v61 = vsel %vm148_vm2, %v752_v6, %v754_v8  ;;  %v756_v9 = vpop.f32.mrb[22].mxu0  ;;  %v999_v6 = vld [vmem:[%s2115_s3 + $0x88] sm:$0xff]  ;;  %v1000_v8 = vld [vmem:[%s2115_s3 + $0x90] sm:$0xff]  ;;  %vm1297_vm2 = vcmask 785408  }
0x13f9   :  { %v765_v10 = vadd.f32 %v759_v61, %v1706_v1  ;;  %v757_v11 = vpop.f32.mrb[23].mxu0  ;;  %v760_v12 = vadd.f32 %v759_v61, %v1703_v62  ;;  %v1007_v61 = vpack.c.bf16 %v999_v6, %v998_v5  ;;  %v1001_v9 = vld [vmem:[%s2115_s3 + $0x98] sm:$0xff] }
0x13fa   :  { %v986_v11 = vld [vmem:[%s2115_s3 + $0x48] sm:$0xff] }
0x13fb   :  { %767 = vrot.lane.b32.xlu1 %v765_v10, %s1556_s28  ;;  %v761_v14 = vmul.f32 0.5, %v760_v12  ;;  %v985_v10 = vld [vmem:[%s2115_s3 + $0x40] sm:$0xff]  ;;  %1414 = vmatpush3.bf16.msra.mxu0 %v1007_v61 }
0x13fc   :  { %v994_v12 = vpack.c.bf16 %v986_v11, %v985_v10  ;;  %1415 = vmatprep.subr.bf16.mxu0 %v1558_v30 }
0x13fd   :  { %1511 = vtanh.f32 %v761_v14  ;;  %v987_v14 = vld [vmem:[%s2115_s3 + $0x50] sm:$0xff] }
0x1407   :  { %v1512_v15 = vpop.eup %1511 }
0x1408   :  { %v763_v59 = vadd.f32 1.0, %v1512_v15  ;;  %v1008_v15 = vpack.c.bf16 %v1001_v9, %v1000_v8 }
0x140a   :  { %v764_v16 = vmul.f32 0.5, %v763_v59  ;;  %v988_v59 = vld [vmem:[%s2115_s3 + $0x58] sm:$0xff]  ;;  %1416 = vmatpush3.bf16.msra.mxu0 %v1008_v15 }
0x140b   :  { %1417 = vmatprep.subr.bf16.mxu0 %v1558_v30 }
0x140c   :  { %v777_v23 = vsub.f32 1.0, %v764_v16  ;;  %v783_v21 = vmul.f32 %v764_v16, %v704_v2 }
0x146d   :  { %v768_v18 = vpop.permute.xlu1 %767 }
0x146e   :  { %v770_v19 = vmul.f32 %v768_v18, %v764_v16  ;;  %v1002_v16 = vld [vmem:[%s2115_s3 + $0xa0] sm:$0xff]  ;;  %v1003_v18 = vld [vmem:[%s2115_s3 + $0xa8] sm:$0xff] }
0x1470   :  { %772 = vrot.lane.b32.xlu0 %v770_v19, %s1556_s28  ;;  %v995_v19 = vpack.c.bf16 %v988_v59, %v987_v14  ;;  %v1004_v59 = vld [vmem:[%s2115_s3 + $0xb0] sm:$0xff] }
0x1474   :  { %224 = vrot.lane.b32.xlu0 %v1718_v26, %s1557_s2 }
0x1478   :  { %386 = vrot.lane.b32.xlu0 %v1756_v20, %s1557_s2 }
0x147c   :  { %546 = vrot.lane.b32.xlu0 %v1795_v13, %s1557_s2 }
0x1480   :  { %706 = vrot.lane.b32.xlu0 %v704_v2, %s1557_s2 }
0x14e2   :  { %v773_v32 = vpop.permute.xlu0 %772 }
0x14e3   :  { %v775_v1 = vadd.f32 %v773_v32, %v1703_v62  ;;  %v1009_v32 = vpack.c.bf16 %v1003_v18, %v1002_v16  ;;  %v1005_v16 = vld [vmem:[%s2115_s3 + $0xb8] sm:$0xff]  ;;  %v989_v18 = vld [vmem:[%s2115_s3 + $0x60] sm:$0xff] }
0x14e5   :  { %1513 = vtanh.f32 %v775_v1  ;;  %1418 = vmatpush3.bf16.msra.mxu0 %v1009_v32  ;;  %v1959_v1 = vld [vmem:[%s2113_s1] sm:$0xff]  ;;  %v990_v32 = vld [vmem:[%s2115_s3 + $0x68] sm:$0xff] }
0x14e6   :  { %v225_v22 = vpop.permute.xlu0 %224  ;;  %1419 = vmatprep.subr.bf16.mxu0 %v1558_v30  ;;  %vm880_vm7 = vcmp.gt.f32.partialorder %v1959_v1, 0.0 }
0x14e7   :  { %228 = vst.msk [vmem:[#allocation2] sm:$0x3] %vm227_vm3, %v225_v22 }
0x14e8   :  { %230 = vst.msk [vmem:[#allocation3 + $0xc] sm:$0xc] %vm229_vm4, %v225_v22 }
0x14ea   :  { %v387_v26 = vpop.permute.xlu0 %386 }
0x14eb   :  { %389 = vst.msk [vmem:[#allocation2 + $0x4] sm:$0x3] %vm227_vm3, %v387_v26 }
0x14ec   :  { %390 = vst.msk [vmem:[#allocation3 + $0x8] sm:$0xc] %vm229_vm4, %v387_v26 }
0x14ee   :  { %v547_v20 = vpop.permute.xlu0 %546 }
0x14ef   :  { %v1514_v13 = vpop.eup %1513  ;;  %549 = vst.msk [vmem:[#allocation2 + $0x8] sm:$0x3] %vm227_vm3, %v547_v20 }
0x14f0   :  { %550 = vst.msk [vmem:[#allocation3 + $0x4] sm:$0xc] %vm229_vm4, %v547_v20  ;;  %779 = vrot.lane.b32.xlu1 %v1514_v13, %s1557_s2  ;;  %v1967_v20 = vld [vmem:[%s2113_s1 + $0x8] sm:$0xff] }
0x14f1   :  { %vm881_vm8 = vcmp.gt.f32.partialorder %v1967_v20, 0.0 }
0x14f2   :  { %v707_v62 = vpop.permute.xlu0 %706 }
0x14f3   :  { %709 = vst.msk [vmem:[#allocation2 + $0xc] sm:$0x3] %vm227_vm3, %v707_v62 }
0x14f4   :  { %710 = vst.msk [vmem:[#allocation3] sm:$0xc] %vm229_vm4, %v707_v62  ;;  %306 = vrot.lane.b32.xlu1 %v1736_v52, %s1557_s2  ;;  %v808_v52 = vld [vmem:[%s2115_s3 + $0x8] sm:$0xff] }
0x14f5   :  { %v816_v29 = vpack.c.bf16 %v808_v52, %v807_v27 }
0x14f7   :  { %1402 = vmatpush3.bf16.msra.mxu1 %v816_v29 }
0x14f8   :  { %466 = vrot.lane.b32.xlu1 %v1776_v46, %s1557_s2  ;;  %v809_v46 = vld [vmem:[%s2115_s3 + $0x10] sm:$0xff]  ;;  %1403 = vmatprep.subr.bf16.mxu1 %v1558_v30 }
0x14f9   :  { %v817_v33 = vpack.c.bf16 %v810_v31, %v809_v46 }
0x14fb   :  { %1404 = vmatpush3.bf16.msra.mxu1 %v817_v33 }
0x14fc   :  { %626 = vrot.lane.b32.xlu1 %v1814_v38, %s1557_s2  ;;  %1405 = vmatprep.subr.bf16.mxu1 %v1558_v30 }
0x14ff   :  { %1406 = vmatpush3.bf16.msra.mxu1 %v818_v37 }
0x1500   :  { %1407 = vmatprep.subr.bf16.mxu1 %v1558_v30 }
0x1503   :  { %1408 = vmatpush3.bf16.msra.mxu1 %v819_v40 }
0x1504   :  { %1425 = vmatprep.subr.bf16.mxu1 %v1558_v30 }
0x1562   :  { %v780_v57 = vpop.permute.xlu1 %779 }
0x1563   :  { %v782_v24 = vmul.f32 %v780_v57, %v777_v23 }
0x1565   :  { %v784_v25 = vadd.f32 %v783_v21, %v782_v24 }
0x1566   :  { %v307_v28 = vpop.permute.xlu1 %306 }
0x1567   :  { %309 = vst.msk [vmem:[#allocation2 + $0x2] sm:$0x3] %vm227_vm3, %v307_v28  ;;  %786 = vrot.lane.b32.xlu1 %v784_v25, %s1557_s2 }
0x1568   :  { %310 = vst.msk [vmem:[#allocation3 + $0xa] sm:$0xc] %vm229_vm4, %v307_v28 }
0x156a   :  { %v467_v34 = vpop.permute.xlu1 %466 }
0x156b   :  { %469 = vst.msk [vmem:[#allocation2 + $0x6] sm:$0x3] %vm227_vm3, %v467_v34 }
0x156c   :  { %470 = vst.msk [vmem:[#allocation3 + $0x6] sm:$0xc] %vm229_vm4, %v467_v34 }
0x156e   :  { %v627_v38 = vpop.permute.xlu1 %626 }
0x156f   :  { %629 = vst.msk [vmem:[#allocation2 + $0xa] sm:$0x3] %vm227_vm3, %v627_v38 }
0x1570   :  { %630 = vst.msk [vmem:[#allocation3 + $0x2] sm:$0xc] %vm229_vm4, %v627_v38 }
0x1572   :  { %v791_v45 = vld [vmem:[#allocation2] sm:$0xff] }
0x1573   :  { %v794_v17 = vld [vmem:[#allocation3 + $0x8] sm:$0xff] }
0x1574   :  { %799 = vrot.lane.b32.xlu1 %v794_v17, %s1559_s0 }
0x15d9   :  { %v787_v41 = vpop.permute.xlu1 %786 }
0x15da   :  { %789 = vst.msk [vmem:[#allocation2 + $0xe] sm:$0x3] %vm227_vm3, %v787_v41  ;;  %vm1341_vm3 = vcmask 33792  }
0x15db   :  { %790 = vst.msk [vmem:[#allocation3 - $0x2] sm:$0xc] %vm229_vm4, %v787_v41 }
0x15e1   :  { %v792_v44 = vld [vmem:[#allocation2 + $0x8] sm:$0xff] }
0x15e2   :  { %v793_v42 = vld [vmem:[#allocation3] sm:$0xff] }
0x15e3   :  { %797 = vrot.lane.b32.xlu0 %v793_v42, %s1559_s0 }
0x15e6   :  { %v800_v43 = vpop.permute.xlu1 %799 }
0x15e7   :  { %v1906_v48 = vsel %vm63_vm1, %v792_v44, %v800_v43 }
0x1655   :  { %v798_v47 = vpop.permute.xlu0 %797 }
0x1656   :  { %v1909_v3 = vsel %vm63_vm1, %v791_v45, %v798_v47 }
0x1657   :  { %v815_v49 = vpack.c.bf16 %v1906_v48, %v1909_v3 }
0x1659   :  { %1410 = vmatmul.mubr.msk.bf16.vlgmr.msra.gmra.mrb[12].mxu1 %vm820_vm6, %v815_v49 }
0x165a   :  { %1433 = vmatprep.mubr.msk.bf16.mxu1 %vm1560_vm5, %v1558_v30  ;;  %1426 = vmatpush3.bf16.msra.mxu1 %v994_v12 }
0x165b   :  { %1427 = vmatprep.subr.bf16.mxu1 %v1558_v30 }
0x165e   :  { %1428 = vmatpush3.bf16.msra.mxu1 %v995_v19  ;;  %v1010_v19 = vpack.c.bf16 %v1005_v16, %v1004_v59 }
0x165f   :  { %1429 = vmatprep.subr.bf16.mxu1 %v1558_v30 }
0x1660   :  { %1420 = vmatpush3.bf16.msra.mxu0 %v1010_v19 }
0x1661   :  { %1437 = vmatprep.subr.bf16.mxu0 %v1558_v30 }
0x172c   :  { %v858_v50 = vpop.f32.mrb[12].mxu1 }
0x172d   :  { %1515 = vtanh.f32 %v858_v50  ;;  %v1411_v51 = vpop.f32.mrb[13].mxu1 }
0x172e   :  { %v861_v53 = vpop.f32.mrb[14].mxu1 }
0x172f   :  { %1517 = vtanh.f32 %v861_v53  ;;  %v1412_v54 = vpop.f32.mrb[15].mxu1 }
0x1737   :  { %v1516_v56 = vpop.eup %1515 }
0x1738   :  { %v872_v58 = vmul.f32 %v1516_v56, %v1367_v55 }
0x1739   :  { %v1518_v63 = vpop.eup %1517 }
0x173a   :  { %v874_v0 = vsel %vm820_vm6, %v872_v58, 0.0  ;;  %v873_v2 = vmul.f32 %v1518_v63, %v1367_v55 }
0x173b   :  { %875 = vadd.xlane.f32.xlu0 %v874_v0 }
0x173c   :  { %v877_v4 = vsel %vm820_vm6, %v873_v2, 0.0 }
0x173d   :  { %878 = vadd.xlane.f32.xlu1 %v877_v4 }
0x17c8   :  { %v876_v22 = vpop.xlane.xlu0 %875 }
0x17c9   :  { %v882_v26 = vsel %vm880_vm7, %v876_v22, -1e+30  ;;  %v996_v22 = vpack.c.bf16 %v990_v32, %v989_v18 }
0x17ca   :  { %v885_v13 = vrot.slane %v882_v26, 2  ;;  %v888_v23 = vrot.slane %v882_v26, 4  ;;  %v879_v57 = vpop.xlane.xlu1 %878  ;;  %v891_v24 = vrot.slane %v882_v26, 6 }
0x17cb   :  { %v883_v25 = vsel %vm881_vm8, %v879_v57, -1e+30  ;;  %1430 = vmatpush3.bf16.msra.mxu1 %v996_v22  ;;  %v1561_v57 = vmov 2  }
0x17cc   :  { %v887_v62 = vmax.f32 %v882_v26, %v885_v13  ;;  %v896_v52 = vrot.slane %v883_v25, 2  ;;  %v899_v29 = vrot.slane %v883_v25, 4  ;;  %v902_v33 = vrot.slane %v883_v25, 6  ;;  %v992_v13 = vld [vmem:[%s2115_s3 + $0x78] sm:$0xff]  ;;  %1431 = vmatprep.subr.bf16.mxu1 %v1558_v30 }
0x17ce   :  { %v890_v21 = vmax.f32 %v887_v62, %v888_v23  ;;  %v1165_v23 = vsel %vm880_vm7, 1, %v1555_v7 }
0x17d0   :  { %v893_v28 = vmax.f32 %v890_v21, %v891_v24  ;;  %v1562_v21 = vmov 3   ;;  %v1166_v24 = vsel %vm881_vm8, 1, %v1555_v7 }
0x17d2   :  { %v894_v27 = vmax.f32 %v893_v28, %v883_v25 }
0x17d4   :  { %v898_v46 = vmax.f32 %v894_v27, %v896_v52  ;;  %v1099_v27 = vld [vmem:[%s2115_s3 + $0xc0] sm:$0xff]  ;;  %v1100_v52 = vld [vmem:[%s2115_s3 + $0xc8] sm:$0xff] }
0x17d6   :  { %v901_v31 = vmax.f32 %v898_v46, %v899_v29 }
0x17d8   :  { %v904_v34 = vmax.f32 %v901_v31, %v902_v33  ;;  %v1108_v31 = vpack.c.bf16 %v1100_v52, %v1099_v27 }
0x17da   :  { %v906_v35 = vrot.slane %v904_v34, 6  ;;  %v908_v36 = vrot.slane %v904_v34, 4  ;;  %v910_v37 = vrot.slane %v904_v34, 2 }
0x17dc   :  { %v912_v38 = vsel %vm43_vm0, %v904_v34, %v906_v35  ;;  %v1101_v34 = vld [vmem:[%s2115_s3 + $0xd0] sm:$0xff]  ;;  %v1102_v35 = vld [vmem:[%s2115_s3 + $0xd8] sm:$0xff] }
0x17dd   :  { %v914_v17 = vsel %vm913_vm9, %v912_v38, %v908_v36 }
0x17de   :  { %v916_v39 = vsel %vm915_vm10, %v914_v17, %v910_v37  ;;  %v1104_v17 = vld [vmem:[%s2115_s3 + $0xe8] sm:$0xff] }
0x17df   :  { %v917_v60 = vsub.f32 %v882_v26, %v916_v39  ;;  %v918_v40 = vsub.f32 %v883_v25, %v916_v39  ;;  %v991_v26 = vld [vmem:[%s2115_s3 + $0x70] sm:$0xff]  ;;  %v1563_v25 = vmov 1  }
0x17e0   :  { %v997_v62 = vpack.c.bf16 %v992_v13, %v991_v26 }
0x17e1   :  { %v919_v41 = vmul.f32 1.442695, %v917_v60  ;;  %v921_v42 = vmul.f32 1.442695, %v918_v40  ;;  %v1105_v60 = vld [vmem:[%s2115_s3 + $0xf0] sm:$0xff]  ;;  %v1106_v40 = vld [vmem:[%s2115_s3 + $0xf8] sm:$0xff] }
0x17e2   :  { %1432 = vmatpush3.bf16.msra.mxu1 %v997_v62  ;;  %v1371_v62 = vld [vmem:[%s2115_s3 + $0x161] ss:$0 sm:$0xff] }
0x17e3   :  { %1519 = vpow2.f32 %v919_v41  ;;  %1449 = vmatprep.subr.bf16.mxu1 %v1558_v30 }
0x17e4   :  { %1521 = vpow2.f32 %v921_v42 }
0x17ed   :  { %v1520_v43 = vpop.eup %1519 }
0x17ee   :  { %v924_v44 = vrot.slane %v1520_v43, 2  ;;  %v927_v47 = vrot.slane %v1520_v43, 4  ;;  %v930_v50 = vrot.slane %v1520_v43, 6  ;;  %v1522_v51 = vpop.eup %1521 }
0x17ef   :  { %v935_v55 = vrot.slane %v1522_v51, 2  ;;  %v938_v58 = vrot.slane %v1522_v51, 4  ;;  %v941_v0 = vrot.slane %v1522_v51, 6 }
0x17f0   :  { %v926_v45 = vadd.f32 %v1520_v43, %v924_v44 }
0x17f2   :  { %v929_v49 = vadd.f32 %v927_v47, %v926_v45 }
0x17f4   :  { %v932_v53 = vadd.f32 %v930_v50, %v929_v49  ;;  %v1273_v49 = vld [vmem:[%s2115_s3 + $0x100] sm:$0xff]  ;;  %v1274_v50 = vld [vmem:[%s2115_s3 + $0x108] sm:$0xff] }
0x17f6   :  { %v933_v54 = vadd.f32 %v1522_v51, %v932_v53  ;;  %v1286_v53 = vpack.c.bf16 %v1274_v50, %v1273_v49 }
0x17f8   :  { %v937_v56 = vadd.f32 %v935_v55, %v933_v54  ;;  %v1276_v54 = vld [vmem:[%s2115_s3 + $0x118] sm:$0xff] }
0x17fa   :  { %v940_v63 = vadd.f32 %v938_v58, %v937_v56  ;;  %v1277_v56 = vld [vmem:[%s2115_s3 + $0x120] sm:$0xff]  ;;  %v1278_v58 = vld [vmem:[%s2115_s3 + $0x128] sm:$0xff] }
0x17fc   :  { %v943_v2 = vadd.f32 %v941_v0, %v940_v63  ;;  %v1288_v63 = vpack.c.bf16 %v1278_v58, %v1277_v56  ;;  %v1279_v0 = vld [vmem:[%s2115_s3 + $0x130] sm:$0xff] }
0x17fe   :  { %v945_v4 = vrot.slane %v943_v2, 6  ;;  %v947_v5 = vrot.slane %v943_v2, 4  ;;  %v949_v6 = vrot.slane %v943_v2, 2 }
0x1800   :  { %v951_v8 = vsel %vm43_vm0, %v943_v2, %v945_v4  ;;  %v1280_v2 = vld [vmem:[%s2115_s3 + $0x138] sm:$0xff] }
0x1801   :  { %v952_v61 = vsel %vm913_vm9, %v951_v8, %v947_v5  ;;  %v1289_v4 = vpack.c.bf16 %v1280_v2, %v1279_v0  ;;  %v1281_v5 = vld [vmem:[%s2115_s3 + $0x140] sm:$0xff] }
0x1802   :  { %v953_v9 = vsel %vm915_vm10, %v952_v61, %v949_v6  ;;  %v1282_v6 = vld [vmem:[%s2115_s3 + $0x148] sm:$0xff] }
0x1803   :  { %1523 = vrcp.f32 %v953_v9  ;;  %v1290_v8 = vpack.c.bf16 %v1282_v6, %v1281_v5 }
0x180d   :  { %v1524_v10 = vpop.eup %1523 }
0x180e   :  { %v956_v11 = vmul.f32 %v1524_v10, %v1522_v51  ;;  %v955_v12 = vmul.f32 %v1524_v10, %v1520_v43  ;;  %v1111_v43 = vpack.c.bf16 %v1106_v40, %v1105_v60  ;;  %v1275_v51 = vld [vmem:[%s2115_s3 + $0x110] sm:$0xff] }
0x180f   :  { %v1287_v55 = vpack.c.bf16 %v1276_v54, %v1275_v51 }
0x1810   :  { %v958_v14 = vmul.f32 %v956_v11, %v1967_v20  ;;  %v957_v15 = vmul.f32 %v955_v12, %v1959_v1 }
0x1812   :  { %966 = vperm.xlu1 %1476, %v958_v14   ;;  %961 = vperm.xlu0 %1475, %v957_v15  }
0x1816   :  { %1477 = vset.pattern.permute.xlu1 %v1561_v57  ;;  %1482 = vset.pattern.permute.xlu0 %v1562_v21 }
0x1817   :  { %1200 = vperm.xlu1 %1477, %v1165_v23  }
0x181b   :  { %1478 = vset.pattern.permute.xlu1 %v1562_v21 }
0x181c   :  { %1232 = vperm.xlu1 %1478, %v1165_v23  }
0x1820   :  { %1479 = vset.pattern.permute.xlu1 %v1561_v57 }
0x1821   :  { %1203 = vperm.xlu1 %1479, %v1166_v24  }
0x1825   :  { %1480 = vset.pattern.permute.xlu1 %v1562_v21 }
0x1826   :  { %1235 = vperm.xlu1 %1480, %v1166_v24  }
0x182a   :  { %1481 = vset.pattern.permute.xlu1 %v1563_v25 }
0x182b   :  { %1168 = vperm.xlu1 %1481, %v1165_v23  }
0x182f   :  { %1171 = vperm.xlu1 %1481, %v1166_v24  }
0x1891   :  { %v967_v1 = vpop.permute.xlu1 %966  ;;  %v962_v28 = vpop.permute.xlu0 %961 }
0x1892   :  { %v970_v7 = vmul.f32 %v967_v1, %v1906_v48  ;;  %v969_v20 = vmul.f32 %v962_v28, %v1909_v3  ;;  %v1109_v48 = vpack.c.bf16 %v1102_v35, %v1101_v34  ;;  %v1103_v3 = vld [vmem:[%s2115_s3 + $0xe0] sm:$0xff] }
0x1893   :  { %v1110_v39 = vpack.c.bf16 %v1104_v17, %v1103_v3 }
0x1894   :  { %v974_v46 = vrot.slane %v970_v7, 6  ;;  %v973_v29 = vrot.slane %v969_v20, 6  ;;  %v1006_v33 = vpack.c.bf16 %v970_v7, %v969_v20  ;;  %v980_v41 = vrot.slane %v970_v7, 2 }
0x1895   :  { %v979_v42 = vrot.slane %v969_v20, 2 }
0x1896   :  { %v975_v36 = vsel %vm43_vm0, %v973_v29, %v974_v46  ;;  %v978_v37 = vsel %vm43_vm0, 0.0, %v973_v29  ;;  %1422 = vmatmul.mubr.msk.bf16.vlgmr.msra.gmra.mrb[24].mxu0 %vm820_vm6, %v1006_v33  ;;  %v984_v44 = vsel %vm915_vm10, %v980_v41, 0.0  ;;  %v1201_v61 = vpop.permute.xlu1 %1200 }
0x1897   :  { %v993_v38 = vpack.c.bf16 %v975_v36, %v978_v37  ;;  %1438 = vmatpush3.bf16.msra.mxu0 %v1108_v31  ;;  %1445 = vmatprep.mubr.msk.bf16.mxu0 %vm1560_vm5, %v1558_v30  ;;  %v981_v45 = vsel %vm915_vm10, %v979_v42, %v980_v41  ;;  %vm1205_vm13 = vcmp.eq.s32.totalorder %v1201_v61, 1 }
0x1898   :  { %1439 = vmatprep.subr.bf16.mxu0 %v1558_v30  ;;  %v1107_v47 = vpack.c.bf16 %v984_v44, %v981_v45 }
0x1899   :  { %1434 = vmatmul.mubr.msk.bf16.vlgmr.msra.gmra.mrb[16].mxu1 %vm820_vm6, %v993_v38 }
0x189a   :  { %1461 = vmatprep.mubr.msk.bf16.mxu1 %vm1560_vm5, %v1558_v30  ;;  %1450 = vmatpush3.bf16.msra.mxu1 %v1286_v53 }
0x189b   :  { %1440 = vmatpush3.bf16.msra.mxu0 %v1109_v48  ;;  %1451 = vmatprep.subr.bf16.mxu1 %v1558_v30  ;;  %v1233_v9 = vpop.permute.xlu1 %1232 }
0x189c   :  { %1441 = vmatprep.subr.bf16.mxu0 %v1558_v30  ;;  %vm1237_vm11 = vcmp.eq.s32.totalorder %v1233_v9, 1 }
0x189e   :  { %1452 = vmatpush3.bf16.msra.mxu1 %v1287_v55 }
0x189f   :  { %1442 = vmatpush3.bf16.msra.mxu0 %v1110_v39  ;;  %1453 = vmatprep.subr.bf16.mxu1 %v1558_v30 }
0x18a0   :  { %1443 = vmatprep.subr.bf16.mxu0 %v1558_v30  ;;  %v1204_v19 = vpop.permute.xlu1 %1203 }
0x18a1   :  { %vm1206_vm14 = vcmp.eq.s32.totalorder %v1204_v19, 1 }
0x18a2   :  { %1454 = vmatpush3.bf16.msra.mxu1 %v1288_v63 }
0x18a3   :  { %1444 = vmatpush3.bf16.msra.mxu0 %v1111_v43  ;;  %1455 = vmatprep.subr.bf16.mxu1 %v1558_v30 }
0x18a5   :  { %v1236_v26 = vpop.permute.xlu1 %1235 }
0x18a6   :  { %1446 = vmatmul.mubr.msk.bf16.vlgmr.msra.gmra.mrb[28].mxu0 %vm820_vm6, %v1107_v47  ;;  %1456 = vmatpush3.bf16.msra.mxu1 %v1289_v4  ;;  %vm1238_vm15 = vcmp.eq.s32.totalorder %v1236_v26, 1 }
0x18a7   :  { %1457 = vmatprep.subr.bf16.mxu1 %v1558_v30 }
0x18aa   :  { %1458 = vmatpush3.bf16.msra.mxu1 %v1290_v8 }
0x18ab   :  { %1459 = vmatprep.subr.bf16.mxu1 %v1558_v30  ;;  %v1169_v30 = vpop.permute.xlu1 %1168 }
0x18ac   :  { %vm1173_vm12 = vcmp.eq.s32.totalorder %v1169_v30, 1 }
0x18af   :  { %v1172_v46 = vpop.permute.xlu1 %1171 }
0x18b0   :  { %vm1174_vm0 = vcmp.eq.s32.totalorder %v1172_v46, 1 }
0x1969   :  { %v1048_v10 = vpop.f32.mrb[24].mxu0 }
0x196a   :  { %v1423_v11 = vpop.f32.mrb[25].mxu0 }
0x196b   :  { %v1051_v12 = vpop.f32.mrb[26].mxu0 }
0x196c   :  { %v1092_v14 = vpop.f32.mrb[16].mxu1  ;;  %v1424_v15 = vpop.f32.mrb[27].mxu0 }
0x196d   :  { %v1093_v59 = vadd.f32 %v1092_v14, %v1048_v10  ;;  %v1435_v16 = vpop.f32.mrb[17].mxu1  ;;  %v1283_v15 = vld [vmem:[%s2115_s3 + $0x150] sm:$0xff] }
0x196e   :  { %v1095_v18 = vpop.f32.mrb[18].mxu1 }
0x196f   :  { %v1096_v32 = vadd.f32 %v1095_v18, %v1051_v12  ;;  %v1436_v22 = vpop.f32.mrb[19].mxu1 }
0x1979   :  { %v1149_v13 = vpop.f32.mrb[28].mxu0 }
0x197a   :  { %v1156_v23 = vadd.f32 %v1149_v13, %v1093_v59  ;;  %v1447_v57 = vpop.f32.mrb[29].mxu0  ;;  %v1284_v59 = vld [vmem:[%s2115_s3 + $0x158] sm:$0xff] }
0x197b   :  { %v1152_v21 = vpop.f32.mrb[30].mxu0  ;;  %v1291_v16 = vpack.c.bf16 %v1284_v59, %v1283_v15 }
0x197c   :  { %v1163_v24 = vadd.f32 %v1371_v62, %v1156_v23  ;;  %v1157_v25 = vadd.f32 %v1152_v21, %v1096_v32  ;;  %v1448_v1 = vpop.f32.mrb[31].mxu0  ;;  %v1372_v23 = vld [vmem:[%s2115_s3 + $0x162] ss:$0 sm:$0xff] }
0x197d   :  { %1460 = vmatpush3.bf16.msra.mxu1 %v1291_v16 }
0x197e   :  { %v1207_v28 = vsel %vm1205_vm13, %v1163_v24, -1e+30  ;;  %v1239_v27 = vsel %vm1237_vm11, %v1163_v24, -1e+30  ;;  %v1175_v52 = vsel %vm1173_vm12, %v1163_v24, -1e+30  ;;  %v1164_v31 = vadd.f32 %v1371_v62, %v1157_v25 }
0x197f   :  { %v1210_v7 = vrot.slane %v1207_v28, 2  ;;  %v1242_v20 = vrot.slane %v1239_v27, 2  ;;  %v1178_v29 = vrot.slane %v1175_v52, 2  ;;  %v1213_v34 = vrot.slane %v1207_v28, 4 }
0x1980   :  { %v1245_v36 = vrot.slane %v1239_v27, 4  ;;  %v1181_v38 = vrot.slane %v1175_v52, 4  ;;  %v1216_v3 = vrot.slane %v1207_v28, 6  ;;  %v1248_v39 = vrot.slane %v1239_v27, 6 }
0x1981   :  { %v1212_v33 = vmax.f32 %v1207_v28, %v1210_v7  ;;  %v1244_v35 = vmax.f32 %v1239_v27, %v1242_v20  ;;  %v1180_v37 = vmax.f32 %v1175_v52, %v1178_v29  ;;  %v1184_v40 = vrot.slane %v1175_v52, 6 }
0x1982   :  { %v1208_v41 = vsel %vm1206_vm14, %v1164_v31, -1e+30  ;;  %v1240_v42 = vsel %vm1238_vm15, %v1164_v31, -1e+30  ;;  %v1176_v45 = vsel %vm1174_vm0, %v1164_v31, -1e+30 }
0x1983   :  { %v1215_v48 = vmax.f32 %v1212_v33, %v1213_v34  ;;  %v1247_v17 = vmax.f32 %v1244_v35, %v1245_v36  ;;  %v1183_v60 = vmax.f32 %v1180_v37, %v1181_v38  ;;  %v1221_v50 = vrot.slane %v1208_v41, 2 }
0x1984   :  { %v1253_v53 = vrot.slane %v1240_v42, 2  ;;  %v1189_v55 = vrot.slane %v1176_v45, 2  ;;  %v1224_v58 = vrot.slane %v1208_v41, 4  ;;  %v1256_v0 = vrot.slane %v1240_v42, 4 }
0x1985   :  { %v1218_v43 = vmax.f32 %v1215_v48, %v1216_v3  ;;  %v1250_v44 = vmax.f32 %v1247_v17, %v1248_v39  ;;  %v1186_v47 = vmax.f32 %v1183_v60, %v1184_v40  ;;  %v1192_v4 = vrot.slane %v1176_v45, 4 }
0x1986   :  { %v1227_v6 = vrot.slane %v1208_v41, 6  ;;  %v1259_v61 = vrot.slane %v1240_v42, 6  ;;  %v1195_v10 = vrot.slane %v1176_v45, 6 }
0x1987   :  { %v1219_v49 = vmax.f32 %v1218_v43, %v1208_v41  ;;  %v1251_v51 = vmax.f32 %v1250_v44, %v1240_v42  ;;  %v1187_v54 = vmax.f32 %v1186_v47, %v1176_v45 }
0x1989   :  { %v1223_v56 = vmax.f32 %v1219_v49, %v1221_v50  ;;  %v1255_v63 = vmax.f32 %v1251_v51, %v1253_v53  ;;  %v1191_v2 = vmax.f32 %v1187_v54, %v1189_v55 }
0x198b   :  { %v1226_v5 = vmax.f32 %v1223_v56, %v1224_v58  ;;  %v1258_v8 = vmax.f32 %v1255_v63, %v1256_v0  ;;  %v1194_v9 = vmax.f32 %v1191_v2, %v1192_v4 }
0x198d   :  { %v1229_v11 = vmax.f32 %v1226_v5, %v1227_v6  ;;  %v1261_v12 = vmax.f32 %v1258_v8, %v1259_v61  ;;  %v1197_v14 = vmax.f32 %v1194_v9, %v1195_v10 }
0x198f   :  { %1525 = vtanh.f32 %v1229_v11 }
0x1990   :  { %1527 = vtanh.f32 %v1261_v12 }
0x1991   :  { %1529 = vtanh.f32 %v1197_v14 }
0x1999   :  { %v1526_v18 = vpop.eup %1525 }
0x199a   :  { %v1528_v19 = vpop.eup %1527  ;;  %1264 = vrot.lane.b32.xlu0 %v1526_v18, %s1559_s0 }
0x199b   :  { %1268 = vrot.lane.b32.xlu1 %v1528_v19, %s1556_s28  ;;  %v1530_v32 = vpop.eup %1529  ;;  %s1531_s28 = scalar_lea.vmem %s1350_s23, 32 }
0x199c   :  { %p1532_p0 = scmp.ne.s32.totalorder %s1350_s23, %s1531_s28  ;;  %p1537_p2 = scmp.lt.s32.totalorder %s1531_s28, %s1531_s28 }
0x199e   :  { %p1538_p3 = por %p1537_p2, %p1536_p1 }
0x19a0   :  { %p1539_p4 = pnand %p1538_p3, %p1532_p0 }
0x1a0c   :  { %v1265_v22 = vpop.permute.xlu0 %1264 }
0x1a0d   :  { %v1269_v26 = vpop.permute.xlu1 %1268  ;;  %v1271_v13 = vsel %vm63_vm1, %v1530_v32, %v1265_v22 }
0x1a0e   :  { %v1272_v62 = vsel %vm820_vm6, %v1271_v13, %v1269_v26 }
0x1a0f   :  { %v1285_v30 = vpack.c.bf16 %v1272_v62, %v1272_v62 }
0x1a11   :  { %1462 = vmatmul.mubr.msk.bf16.vlgmr.msra.gmra.mrb[20].mxu1 %vm1297_vm2, %v1285_v30 }
0x1ae4   :  { %v1335_v57 = vpop.f32.mrb[20].mxu1 }
0x1ae5   :  { %v1336_v21 = vadd.f32 %v1372_v23, %v1335_v57  ;;  %v1463_v24 = vpop.f32.mrb[21].mxu1 }
0x1ae6   :  { %v1338_v25 = vpop.f32.mrb[22].mxu1 }
0x1ae7   :  { %v1464_v1 = vpop.f32.mrb[23].mxu1  ;;  %1342 = vst.msk [vmem:[#allocation4] sm:$0x3] %vm1341_vm3, %v1336_v21 }
0x1ae8   :  { %1542 = shalt.err (!%p1539_p4)
}
0x1ae9   :  { %s1543_s3 = scalar_lea.hbm %s2116_s4, 32 }
0x1aea   :  { %p1544_p5 = scmp.ne.s32.totalorder %s2116_s4, %s1543_s3  ;;  %p1547_p6 = scmp.lt.u32.totalorder %s1543_s3, %s2116_s4 }
0x1aec   :  { %p1549_p7 = pnand %p1547_p6, %p1544_p5 }
0x1aee   :  { %1552 = shalt.err (!%p1549_p7)
}
0x1aef   :  { %1352 = dma.vmem_to_hbm [thread:$0]  %s1350_s23, 32, %s2116_s4, [#allocation5]  }
0x1af0   :  { %1553 = dma.done.wait [#allocation5], 32  }
0x1af1   :  { %1554 = vsyncadd [#allocation5], 4294967264 }
0x1af2   :  { %1356 = vsyncpa [#allocation5], 1 }

</bundles_post_ra>
